<compile_context>
chip_gen: v7x
topology: tpu7x:2x2x1
jax: 0.10.0
libtpu: 0.0.40
codegen_flags: <defaults>
</compile_context>

<pallas_src>
import functools
import math

import jax
import jax.numpy as jnp
from jax import lax
from jax.experimental import pallas as pl
from jax.experimental.pallas import tpu as pltpu

# ---- synthetic (small) BERT config -----------------------------------------
HIDDEN = 128
N_HEADS = 4
HEAD_DIM = HIDDEN // N_HEADS
INTERMEDIATE = 256
N_LAYERS = 2
VOCAB = 100
MAX_POS = 512
TYPE_VOCAB = 2
LN_EPS = 1e-12
ATTN_SCALE = 1.0 / math.sqrt(HEAD_DIM)


# ---- in-kernel helpers (f32 math) -------------------------------------------
def _ln(x, g, b):
    mean = jnp.mean(x, axis=-1, keepdims=True)
    cen = x - mean
    var = jnp.mean(cen * cen, axis=-1, keepdims=True)
    return cen * lax.rsqrt(var + LN_EPS) * g + b


def _gelu_tanh(x):
    # TODO(synk): HF BERT uses erf-based GELU; tanh approximation kept because
    # erf lowering on Mosaic is not guaranteed. Math stays in f32.
    c = 0.7978845608028654  # sqrt(2/pi)
    return 0.5 * x * (1.0 + jnp.tanh(c * (x + 0.044715 * x * x * x)))


# ---- fused whole-encoder kernel ----------------------------------------------
def _fused_encoder_kernel(
    emb_ref, mask_ref, emb_g_ref, emb_b_ref,
    wqkv_ref, bqkv_ref, wo_ref, bo_ref, ln1_g_ref, ln1_b_ref,
    wi_ref, bi_ref, wo2_ref, bo2_ref, ln2_g_ref, ln2_b_ref,
    o_ref, h_scr, *, bt, seq, n_heads, head_dim,
):
    H = emb_ref.shape[2]
    M = bt * seq
    layer = pl.program_id(1)

    # ---- layer-0 prologue: embedding LayerNorm into the resident VMEM scratch ----
    @pl.when(layer == 0)
    def _():
        x = emb_ref[...].reshape(M, H).astype(jnp.float32)
        h_scr[...] = _ln(x, emb_g_ref[...], emb_b_ref[...])

    h = h_scr[...]                                                  # (M, H) f32, token-major

    # ---- fused QKV projection: one bf16 matmul, N = 3H output lanes ----
    # ATTN_SCALE is pre-folded into the Q columns of wqkv/bqkv (param-prep time).
    qkv = jnp.dot(h.astype(jnp.bfloat16), wqkv_ref[...],
                  preferred_element_type=jnp.float32) + bqkv_ref[...]   # (M, 3H) f32

    # ---- multi-head self-attention: per-sample scores, per-head Wo accumulation ----
    # NOTE: per-head Q/K/V extraction is a 32-lane slice of the 384-lane qkv
    # result; unavoidable at Dh=32 without head-tiled weight layouts.
    attn_rows = []
    for bi in range(bt):
        r0 = bi * seq
        # hoisted out of the head loop (JAX does not CSE broadcasts in unrolled loops)
        mask2d = jnp.broadcast_to(mask_ref[bi], (seq, seq))          # (S, S) additive bias
        acc = None
        for hd in range(n_heads):
            lo = hd * head_dim
            q_h = qkv[r0:r0 + seq, lo:lo + head_dim]                 # (S, Dh)
            k_h = qkv[r0:r0 + seq, H + lo:H + lo + head_dim]         # (S, Dh)
            v_h = qkv[r0:r0 + seq, 2 * H + lo:2 * H + lo + head_dim]  # (S, Dh)
            s = jnp.dot(q_h, k_h.T, preferred_element_type=jnp.float32) + mask2d
            s = s - jnp.max(s, axis=-1, keepdims=True)
            p = jnp.exp(s)
            p = p * pl.reciprocal(jnp.sum(p, axis=-1, keepdims=True), approx=True)
            ctx_h = jnp.dot(p, v_h, preferred_element_type=jnp.float32)      # (S, Dh)
            # accumulate through the MXU via a sublane slice of Wo (no lane concat)
            part = jnp.dot(ctx_h.astype(jnp.bfloat16), wo_ref[lo:lo + head_dim, :],
                           preferred_element_type=jnp.float32)               # (S, H)
            acc = part if acc is None else acc + part
        attn_rows.append(acc)
    attn_out = (attn_rows[0] if bt == 1
                else jnp.concatenate(attn_rows, axis=0)) + bo_ref[...]        # (M, H)

    # ---- attention residual + LayerNorm ----
    h1 = _ln(attn_out + h, ln1_g_ref[...], ln1_b_ref[...])

    # ---- feed-forward (GELU) + residual + LayerNorm ----
    inter = jnp.dot(h1.astype(jnp.bfloat16), wi_ref[...],
                    preferred_element_type=jnp.float32) + bi_ref[...]
    inter = _gelu_tanh(inter)
    ffn_out = jnp.dot(inter.astype(jnp.bfloat16), wo2_ref[...],
                      preferred_element_type=jnp.float32) + bo2_ref[...]
    h2 = _ln(ffn_out + h1, ln2_g_ref[...], ln2_b_ref[...])

    h_scr[...] = h2                                                  # carry to next layer

    # ---- epilogue: only the last layer writes the output block ----
    @pl.when(layer == pl.num_programs(1) - 1)
    def _():
        o_ref[...] = h2.reshape(bt, seq, H).astype(o_ref.dtype)


def _pick_batch_tile(batch, seq, target_rows=256):
    """Largest divisor of `batch` whose token count (bt*seq) <= target_rows."""
    bt = max(1, min(batch, target_rows // max(seq, 1)))
    while batch % bt:
        bt -= 1
    return bt


def bert_encoder(emb, mask_bias, p):
    """emb: (B, S, H) summed embeddings (pre-LN). mask_bias: (B, 1, S) additive."""
    B, S, H = emb.shape
    L = p["wqkv"].shape[0]
    bt = _pick_batch_tile(B, S)

    def wspec(shape):
        # per-layer stacked params: leading layer dim squeezed, selected by layer index
        nd = len(shape)
        return pl.BlockSpec((None,) + shape, lambda b, l, _nd=nd: (l,) + (0,) * _nd)

    def rep(shape):
        # grid-invariant params (embedding LayerNorm)
        nd = len(shape)
        return pl.BlockSpec(shape, lambda b, l, _nd=nd: (0,) * _nd)

    kernel = functools.partial(
        _fused_encoder_kernel, bt=bt, seq=S, n_heads=N_HEADS, head_dim=HEAD_DIM)

    return pl.pallas_call(
        kernel,
        out_shape=jax.ShapeDtypeStruct((B, S, H), jnp.float32),
        grid=(B // bt, L),
        in_specs=[
            pl.BlockSpec((bt, S, H), lambda b, l: (b, 0, 0)),          # summed embeddings
            pl.BlockSpec((bt, 1, S), lambda b, l: (b, 0, 0)),          # additive mask
            rep((1, H)), rep((1, H)),                                  # embedding LN g/b
            wspec((H, 3 * H)), wspec((1, 3 * H)),                      # wqkv, bqkv
            wspec((H, H)), wspec((1, H)), wspec((1, H)), wspec((1, H)),  # wo, bo, ln1 g/b
            wspec((H, INTERMEDIATE)), wspec((1, INTERMEDIATE)),        # wi, bi
            wspec((INTERMEDIATE, H)), wspec((1, H)),                   # wo2, bo2
            wspec((1, H)), wspec((1, H)),                              # ln2 g/b
        ],
        out_specs=pl.BlockSpec((bt, S, H), lambda b, l: (b, 0, 0)),
        scratch_shapes=[pltpu.VMEM((bt * S, H), jnp.float32)],          # resident hidden state
        compiler_params=pltpu.CompilerParams(
            dimension_semantics=("parallel", "arbitrary")),
    )(emb, mask_bias,
      p["emb_ln_g"], p["emb_ln_b"],
      p["wqkv"], p["bqkv"], p["wo"], p["bo"], p["attn_ln_g"], p["attn_ln_b"],
      p["wi"], p["bi"], p["wo2"], p["bo2"], p["ffn_ln_g"], p["ffn_ln_b"])


# ---- deterministic parameter init (per-layer weights pre-stacked) -------------
def init_params(key):
    keys = iter(jax.random.split(key, 64))

    def normal(shape, dtype=jnp.float32):
        return (0.02 * jax.random.normal(next(keys), shape)).astype(dtype)

    L = N_LAYERS
    # fused Q|K|V weight; ATTN_SCALE folded into the Q columns (a real checkpoint
    # conversion must also scale the Q bias — zero here).
    wqkv = normal((L, HIDDEN, 3 * HIDDEN))
    wqkv = wqkv.at[:, :, :HIDDEN].multiply(ATTN_SCALE).astype(jnp.bfloat16)

    return {
        "word_emb": normal((VOCAB, HIDDEN)),
        "pos_emb": normal((MAX_POS, HIDDEN)),
        "type_emb": normal((TYPE_VOCAB, HIDDEN)),
        "emb_ln_g": jnp.ones((1, HIDDEN), jnp.float32),
        "emb_ln_b": jnp.zeros((1, HIDDEN), jnp.float32),
        "wqkv": wqkv,
        "bqkv": jnp.zeros((L, 1, 3 * HIDDEN), jnp.float32),
        "wo": normal((L, HIDDEN, HIDDEN), jnp.bfloat16),
        "bo": jnp.zeros((L, 1, HIDDEN), jnp.float32),
        "attn_ln_g": jnp.ones((L, 1, HIDDEN), jnp.float32),
        "attn_ln_b": jnp.zeros((L, 1, HIDDEN), jnp.float32),
        "wi": normal((L, HIDDEN, INTERMEDIATE), jnp.bfloat16),
        "bi": jnp.zeros((L, 1, INTERMEDIATE), jnp.float32),
        "wo2": normal((L, INTERMEDIATE, HIDDEN), jnp.bfloat16),
        "bo2": jnp.zeros((L, 1, HIDDEN), jnp.float32),
        "ffn_ln_g": jnp.ones((L, 1, HIDDEN), jnp.float32),
        "ffn_ln_b": jnp.zeros((L, 1, HIDDEN), jnp.float32),
    }


# ---- model forward (BertModel / ConSERTModel, inference, no aug flags) --------
@jax.jit
def consert_model_forward(params, input_ids, attention_mask, token_type_ids):
    B, S = input_ids.shape
    position_ids = jnp.arange(S, dtype=jnp.int32)[None, :]

    # embedding gathers + single XLA add; LayerNorm happens inside the fused kernel
    emb = (params["word_emb"][input_ids]
           + params["pos_emb"][position_ids]
           + params["type_emb"][token_type_ids])                     # (B, S, H) f32

    # extended attention mask: (1 - mask) * -10000, broadcast over heads & query pos
    ext_mask = ((1.0 - attention_mask.astype(jnp.float32)) * -10000.0)[:, None, :]  # (B, 1, S)

    # NOTE: BertModel's pooler (dense+tanh on CLS) is intentionally skipped:
    # Transformer.forward never exposes pooled_output, so it is dead work.
    return bert_encoder(emb, ext_mask, params)


def transformer_forward(params, features):
    """Mirrors sentence_transformers Transformer.forward semantics (inference path)."""
    input_ids = features["input_ids"]
    B, S = input_ids.shape
    attention_mask = features.get("attention_mask")
    if attention_mask is None:
        attention_mask = jnp.ones((B, S), jnp.int32)
    token_type_ids = features.get("token_type_ids")
    if token_type_ids is None:
        token_type_ids = jnp.zeros((B, S), jnp.int32)

    sequence_output = consert_model_forward(
        params, input_ids, attention_mask, token_type_ids)

    output_tokens = sequence_output
    cls_tokens = output_tokens[:, 0, :]
    features = dict(features)
    features.update(
        {
            "token_embeddings": output_tokens,
            "cls_token_embeddings": cls_tokens,
            "attention_mask": attention_mask,
        }
    )
    return features


if __name__ == "__main__":
    key = jax.random.PRNGKey(0)
    pkey, dkey = jax.random.split(key)
    params = init_params(pkey)

    B, S = 2, 8
    input_ids = jax.random.randint(dkey, (B, S), 0, VOCAB, dtype=jnp.int32)
    attention_mask = jnp.ones((B, S), jnp.int32).at[1, 6:].set(0)  # padding in sample 1

    features = {"input_ids": input_ids, "attention_mask": attention_mask}
    out = transformer_forward(params, features)

    jax.block_until_ready(out["token_embeddings"])
    jax.block_until_ready(out["cls_token_embeddings"])
    assert out["token_embeddings"].shape == (B, S, HIDDEN)
    assert out["cls_token_embeddings"].shape == (B, HIDDEN)
    assert bool(jnp.all(jnp.isfinite(out["token_embeddings"])))
    print("KERNEL_OK")
</pallas_src>

<mosaic_0001>
module attributes {stable_mosaic.version = 11 : i64} {
  func.func @_fused_encoder_kernel(%arg0: i32, %arg1: i32, %arg2: memref<2x8x128xf32, #tpu.memory_space<vmem>>, %arg3: memref<2x1x8xf32, #tpu.memory_space<vmem>>, %arg4: memref<1x128xf32, #tpu.memory_space<vmem>>, %arg5: memref<1x128xf32, #tpu.memory_space<vmem>>, %arg6: memref<1x128x384xbf16, #tpu.memory_space<vmem>>, %arg7: memref<1x1x384xf32, #tpu.memory_space<vmem>>, %arg8: memref<1x128x128xbf16, #tpu.memory_space<vmem>>, %arg9: memref<1x1x128xf32, #tpu.memory_space<vmem>>, %arg10: memref<1x1x128xf32, #tpu.memory_space<vmem>>, %arg11: memref<1x1x128xf32, #tpu.memory_space<vmem>>, %arg12: memref<1x128x256xbf16, #tpu.memory_space<vmem>>, %arg13: memref<1x1x256xf32, #tpu.memory_space<vmem>>, %arg14: memref<1x256x128xbf16, #tpu.memory_space<vmem>>, %arg15: memref<1x1x128xf32, #tpu.memory_space<vmem>>, %arg16: memref<1x1x128xf32, #tpu.memory_space<vmem>>, %arg17: memref<1x1x128xf32, #tpu.memory_space<vmem>>, %arg18: memref<2x8x128xf32, #tpu.memory_space<vmem>>, %arg19: memref<16x128xf32, #tpu.memory_space<vmem>>) attributes {dimension_semantics = [#tpu.dimension_semantics<parallel>, #tpu.dimension_semantics<arbitrary>], iteration_bounds = array<i64: 1, 2>, scalar_prefetch = 0 : i64, scratch_operands = 1 : i64, tpu.core_type = #tpu.core_type<tc>, window_params = [{transform_indices = @transform_0, window_bounds = array<i64: 2, 8, 128>}, {transform_indices = @transform_1, window_bounds = array<i64: 2, 1, 8>}, {pipeline_mode = #tpu.pipeline_mode<synchronous>, transform_indices = @transform_2, window_bounds = array<i64: 1, 128>}, {pipeline_mode = #tpu.pipeline_mode<synchronous>, transform_indices = @transform_3, window_bounds = array<i64: 1, 128>}, {transform_indices = @transform_4, window_bounds = array<i64: 1, 128, 384>}, {transform_indices = @transform_5, window_bounds = array<i64: 1, 1, 384>}, {transform_indices = @transform_6, window_bounds = array<i64: 1, 128, 128>}, {transform_indices = @transform_7, window_bounds = array<i64: 1, 1, 128>}, {transform_indices = @transform_8, window_bounds = array<i64: 1, 1, 128>}, {transform_indices = @transform_9, window_bounds = array<i64: 1, 1, 128>}, {transform_indices = @transform_10, window_bounds = array<i64: 1, 128, 256>}, {transform_indices = @transform_11, window_bounds = array<i64: 1, 1, 256>}, {transform_indices = @transform_12, window_bounds = array<i64: 1, 256, 128>}, {transform_indices = @transform_13, window_bounds = array<i64: 1, 1, 128>}, {transform_indices = @transform_14, window_bounds = array<i64: 1, 1, 128>}, {transform_indices = @transform_15, window_bounds = array<i64: 1, 1, 128>}, {transform_indices = @transform_16, window_bounds = array<i64: 2, 8, 128>}]} {
    %c0_i32 = arith.constant 0 : i32
    %0 = arith.cmpi eq, %arg1, %c0_i32 : i32
    %1 = arith.extui %0 : i1 to i32
    %c0_i32_0 = arith.constant 0 : i32
    %2 = arith.cmpi ne, %1, %c0_i32_0 : i32
    scf.if %2 {
      %c0_120 = arith.constant 0 : index
      %c0_121 = arith.constant 0 : index
      %c0_122 = arith.constant 0 : index
      %282 = vector.load %arg2[%c0_120, %c0_121, %c0_122] : memref<2x8x128xf32, #tpu.memory_space<vmem>>, vector<2x8x128xf32>
      %283 = vector.shape_cast %282 : vector<2x8x128xf32> to vector<16x128xf32>
      %c0_123 = arith.constant 0 : index
      %c0_124 = arith.constant 0 : index
      %284 = vector.load %arg4[%c0_123, %c0_124] : memref<1x128xf32, #tpu.memory_space<vmem>>, vector<1x128xf32>
      %c0_125 = arith.constant 0 : index
      %c0_126 = arith.constant 0 : index
      %285 = vector.load %arg5[%c0_125, %c0_126] : memref<1x128xf32, #tpu.memory_space<vmem>>, vector<1x128xf32>
      %cst_127 = arith.constant dense<0.000000e+00> : vector<16xf32>
      %286 = vector.multi_reduction <add>, %283, %cst_127 [1] : vector<16x128xf32> to vector<16xf32>
      %287 = vector.shape_cast %286 : vector<16xf32> to vector<16x1xf32>
      %cst_128 = arith.constant 1.280000e+02 : f32
      %288 = vector.broadcast %cst_128 : f32 to vector<16x1xf32>
      %289 = arith.divf %287, %288 : vector<16x1xf32>
      %290 = vector.broadcast %289 : vector<16x1xf32> to vector<16x128xf32>
      %291 = arith.subf %283, %290 : vector<16x128xf32>
      %292 = arith.mulf %291, %291 : vector<16x128xf32>
      %cst_129 = arith.constant dense<0.000000e+00> : vector<16xf32>
      %293 = vector.multi_reduction <add>, %292, %cst_129 [1] : vector<16x128xf32> to vector<16xf32>
      %294 = vector.shape_cast %293 : vector<16xf32> to vector<16x1xf32>
      %cst_130 = arith.constant 1.280000e+02 : f32
      %295 = vector.broadcast %cst_130 : f32 to vector<16x1xf32>
      %296 = arith.divf %294, %295 : vector<16x1xf32>
      %cst_131 = arith.constant 9.99999996E-13 : f32
      %297 = vector.broadcast %cst_131 : f32 to vector<16x1xf32>
      %298 = arith.addf %296, %297 : vector<16x1xf32>
      %299 = math.rsqrt %298 : vector<16x1xf32>
      %300 = vector.broadcast %299 : vector<16x1xf32> to vector<16x128xf32>
      %301 = arith.mulf %291, %300 : vector<16x128xf32>
      %302 = vector.broadcast %284 : vector<1x128xf32> to vector<16x128xf32>
      %303 = arith.mulf %301, %302 : vector<16x128xf32>
      %304 = vector.broadcast %285 : vector<1x128xf32> to vector<16x128xf32>
      %305 = arith.addf %303, %304 : vector<16x128xf32>
      %c0_132 = arith.constant 0 : index
      %c0_133 = arith.constant 0 : index
      %306 = vector.load %arg19[%c0_132, %c0_133] : memref<16x128xf32, #tpu.memory_space<vmem>>, vector<16x128xf32>
      tpu.vector_store %arg19[%c0_132, %c0_133], %305 {strides = array<i32>} : memref<16x128xf32, #tpu.memory_space<vmem>>, vector<16x128xf32>,
    } else {
    }
    %c0 = arith.constant 0 : index
    %c0_1 = arith.constant 0 : index
    %3 = vector.load %arg19[%c0, %c0_1] : memref<16x128xf32, #tpu.memory_space<vmem>>, vector<16x128xf32>
    %4 = arith.truncf %3 : vector<16x128xf32> to vector<16x128xbf16>
    %c0_2 = arith.constant 0 : index
    %c0_3 = arith.constant 0 : index
    %c0_4 = arith.constant 0 : index
    %5 = vector.load %arg6[%c0_2, %c0_3, %c0_4] : memref<1x128x384xbf16, #tpu.memory_space<vmem>>, vector<1x128x384xbf16>
    %6 = vector.shape_cast %5 : vector<1x128x384xbf16> to vector<128x384xbf16>
    %cst = arith.constant dense<0.000000e+00> : vector<16x384xf32>
    %7 = tpu.matmul %4, %6, %cst {dimension_numbers = #tpu.dot_dimension_numbers<[1], [0], [0], [1], [0, 0, 1, 1], [], []>} : vector<16x128xbf16>, vector<128x384xbf16>, vector<16x384xf32> -> vector<16x384xf32>
    %c0_5 = arith.constant 0 : index
    %c0_6 = arith.constant 0 : index
    %c0_7 = arith.constant 0 : index
    %8 = vector.load %arg7[%c0_5, %c0_6, %c0_7] : memref<1x1x384xf32, #tpu.memory_space<vmem>>, vector<1x1x384xf32>
    %9 = vector.shape_cast %8 : vector<1x1x384xf32> to vector<1x384xf32>
    %10 = vector.broadcast %9 : vector<1x384xf32> to vector<16x384xf32>
    %11 = arith.addf %7, %10 : vector<16x384xf32>
    %c0_8 = arith.constant 0 : index
    %c0_9 = arith.constant 0 : index
    %c0_10 = arith.constant 0 : index
    %12 = vector.load %arg3[%c0_8, %c0_9, %c0_10] : memref<2x1x8xf32, #tpu.memory_space<vmem>>, vector<1x1x8xf32>
    %13 = vector.shape_cast %12 : vector<1x1x8xf32> to vector<1x8xf32>
    %14 = vector.shape_cast %13 : vector<1x8xf32> to vector<1x8xf32>
    %15 = vector.broadcast %14 : vector<1x8xf32> to vector<8x8xf32>
    %16 = vector.extract_strided_slice %11 {offsets = [0, 0], sizes = [8, 32], strides = [1, 1]} : vector<16x384xf32> to vector<8x32xf32>
    %17 = vector.extract_strided_slice %11 {offsets = [0, 128], sizes = [8, 32], strides = [1, 1]} : vector<16x384xf32> to vector<8x32xf32>
    %18 = vector.extract_strided_slice %11 {offsets = [0, 256], sizes = [8, 32], strides = [1, 1]} : vector<16x384xf32> to vector<8x32xf32>
    %19 = tpu.transpose %17, [1, 0] : vector<8x32xf32> -> vector<32x8xf32>
    %cst_11 = arith.constant dense<0.000000e+00> : vector<8x8xf32>
    %20 = tpu.matmul %16, %19, %cst_11 {dimension_numbers = #tpu.dot_dimension_numbers<[1], [0], [0], [1], [0, 0, 1, 1], [], []>} : vector<8x32xf32>, vector<32x8xf32>, vector<8x8xf32> -> vector<8x8xf32>
    %21 = arith.addf %20, %15 : vector<8x8xf32>
    %cst_12 = arith.constant dense<0xFF800000> : vector<8xf32>
    %22 = vector.multi_reduction <maximumf>, %21, %cst_12 [1] : vector<8x8xf32> to vector<8xf32>
    %23 = vector.shape_cast %22 : vector<8xf32> to vector<8x1xf32>
    %24 = vector.broadcast %23 : vector<8x1xf32> to vector<8x8xf32>
    %25 = arith.subf %21, %24 : vector<8x8xf32>
    %26 = math.exp %25 : vector<8x8xf32>
    %cst_13 = arith.constant dense<0.000000e+00> : vector<8xf32>
    %27 = vector.multi_reduction <add>, %26, %cst_13 [1] : vector<8x8xf32> to vector<8xf32>
    %28 = vector.shape_cast %27 : vector<8xf32> to vector<8x1xf32>
    %29 = tpu.reciprocal %28 {approx = true} : vector<8x1xf32> -> vector<8x1xf32>
    %30 = vector.broadcast %29 : vector<8x1xf32> to vector<8x8xf32>
    %31 = arith.mulf %26, %30 : vector<8x8xf32>
    %cst_14 = arith.constant dense<0.000000e+00> : vector<8x32xf32>
    %32 = tpu.matmul %31, %18, %cst_14 {dimension_numbers = #tpu.dot_dimension_numbers<[1], [0], [0], [1], [0, 0, 1, 1], [], []>} : vector<8x8xf32>, vector<8x32xf32>, vector<8x32xf32> -> vector<8x32xf32>
    %33 = arith.truncf %32 : vector<8x32xf32> to vector<8x32xbf16>
    %c0_15 = arith.constant 0 : index
    %c0_16 = arith.constant 0 : index
    %c0_17 = arith.constant 0 : index
    %34 = vector.load %arg8[%c0_15, %c0_16, %c0_17] : memref<1x128x128xbf16, #tpu.memory_space<vmem>>, vector<1x32x128xbf16>
    %35 = vector.shape_cast %34 : vector<1x32x128xbf16> to vector<32x128xbf16>
    %cst_18 = arith.constant dense<0.000000e+00> : vector<8x128xf32>
    %36 = tpu.matmul %33, %35, %cst_18 {dimension_numbers = #tpu.dot_dimension_numbers<[1], [0], [0], [1], [0, 0, 1, 1], [], []>} : vector<8x32xbf16>, vector<32x128xbf16>, vector<8x128xf32> -> vector<8x128xf32>
    %37 = vector.extract_strided_slice %11 {offsets = [0, 32], sizes = [8, 32], strides = [1, 1]} : vector<16x384xf32> to vector<8x32xf32>
    %38 = vector.extract_strided_slice %11 {offsets = [0, 160], sizes = [8, 32], strides = [1, 1]} : vector<16x384xf32> to vector<8x32xf32>
    %39 = vector.extract_strided_slice %11 {offsets = [0, 288], sizes = [8, 32], strides = [1, 1]} : vector<16x384xf32> to vector<8x32xf32>
    %40 = tpu.transpose %38, [1, 0] : vector<8x32xf32> -> vector<32x8xf32>
    %cst_19 = arith.constant dense<0.000000e+00> : vector<8x8xf32>
    %41 = tpu.matmul %37, %40, %cst_19 {dimension_numbers = #tpu.dot_dimension_numbers<[1], [0], [0], [1], [0, 0, 1, 1], [], []>} : vector<8x32xf32>, vector<32x8xf32>, vector<8x8xf32> -> vector<8x8xf32>
    %42 = arith.addf %41, %15 : vector<8x8xf32>
    %cst_20 = arith.constant dense<0xFF800000> : vector<8xf32>
    %43 = vector.multi_reduction <maximumf>, %42, %cst_20 [1] : vector<8x8xf32> to vector<8xf32>
    %44 = vector.shape_cast %43 : vector<8xf32> to vector<8x1xf32>
    %45 = vector.broadcast %44 : vector<8x1xf32> to vector<8x8xf32>
    %46 = arith.subf %42, %45 : vector<8x8xf32>
    %47 = math.exp %46 : vector<8x8xf32>
    %cst_21 = arith.constant dense<0.000000e+00> : vector<8xf32>
    %48 = vector.multi_reduction <add>, %47, %cst_21 [1] : vector<8x8xf32> to vector<8xf32>
    %49 = vector.shape_cast %48 : vector<8xf32> to vector<8x1xf32>
    %50 = tpu.reciprocal %49 {approx = true} : vector<8x1xf32> -> vector<8x1xf32>
    %51 = vector.broadcast %50 : vector<8x1xf32> to vector<8x8xf32>
    %52 = arith.mulf %47, %51 : vector<8x8xf32>
    %cst_22 = arith.constant dense<0.000000e+00> : vector<8x32xf32>
    %53 = tpu.matmul %52, %39, %cst_22 {dimension_numbers = #tpu.dot_dimension_numbers<[1], [0], [0], [1], [0, 0, 1, 1], [], []>} : vector<8x8xf32>, vector<8x32xf32>, vector<8x32xf32> -> vector<8x32xf32>
    %54 = arith.truncf %53 : vector<8x32xf32> to vector<8x32xbf16>
    %c0_23 = arith.constant 0 : index
    %c32 = arith.constant 32 : index
    %c0_24 = arith.constant 0 : index
    %55 = vector.load %arg8[%c0_23, %c32, %c0_24] : memref<1x128x128xbf16, #tpu.memory_space<vmem>>, vector<1x32x128xbf16>
    %56 = vector.shape_cast %55 : vector<1x32x128xbf16> to vector<32x128xbf16>
    %cst_25 = arith.constant dense<0.000000e+00> : vector<8x128xf32>
    %57 = tpu.matmul %54, %56, %cst_25 {dimension_numbers = #tpu.dot_dimension_numbers<[1], [0], [0], [1], [0, 0, 1, 1], [], []>} : vector<8x32xbf16>, vector<32x128xbf16>, vector<8x128xf32> -> vector<8x128xf32>
    %58 = arith.addf %36, %57 : vector<8x128xf32>
    %59 = vector.extract_strided_slice %11 {offsets = [0, 64], sizes = [8, 32], strides = [1, 1]} : vector<16x384xf32> to vector<8x32xf32>
    %60 = vector.extract_strided_slice %11 {offsets = [0, 192], sizes = [8, 32], strides = [1, 1]} : vector<16x384xf32> to vector<8x32xf32>
    %61 = vector.extract_strided_slice %11 {offsets = [0, 320], sizes = [8, 32], strides = [1, 1]} : vector<16x384xf32> to vector<8x32xf32>
    %62 = tpu.transpose %60, [1, 0] : vector<8x32xf32> -> vector<32x8xf32>
    %cst_26 = arith.constant dense<0.000000e+00> : vector<8x8xf32>
    %63 = tpu.matmul %59, %62, %cst_26 {dimension_numbers = #tpu.dot_dimension_numbers<[1], [0], [0], [1], [0, 0, 1, 1], [], []>} : vector<8x32xf32>, vector<32x8xf32>, vector<8x8xf32> -> vector<8x8xf32>
    %64 = arith.addf %63, %15 : vector<8x8xf32>
    %cst_27 = arith.constant dense<0xFF800000> : vector<8xf32>
    %65 = vector.multi_reduction <maximumf>, %64, %cst_27 [1] : vector<8x8xf32> to vector<8xf32>
    %66 = vector.shape_cast %65 : vector<8xf32> to vector<8x1xf32>
    %67 = vector.broadcast %66 : vector<8x1xf32> to vector<8x8xf32>
    %68 = arith.subf %64, %67 : vector<8x8xf32>
    %69 = math.exp %68 : vector<8x8xf32>
    %cst_28 = arith.constant dense<0.000000e+00> : vector<8xf32>
    %70 = vector.multi_reduction <add>, %69, %cst_28 [1] : vector<8x8xf32> to vector<8xf32>
    %71 = vector.shape_cast %70 : vector<8xf32> to vector<8x1xf32>
    %72 = tpu.reciprocal %71 {approx = true} : vector<8x1xf32> -> vector<8x1xf32>
    %73 = vector.broadcast %72 : vector<8x1xf32> to vector<8x8xf32>
    %74 = arith.mulf %69, %73 : vector<8x8xf32>
    %cst_29 = arith.constant dense<0.000000e+00> : vector<8x32xf32>
    %75 = tpu.matmul %74, %61, %cst_29 {dimension_numbers = #tpu.dot_dimension_numbers<[1], [0], [0], [1], [0, 0, 1, 1], [], []>} : vector<8x8xf32>, vector<8x32xf32>, vector<8x32xf32> -> vector<8x32xf32>
    %76 = arith.truncf %75 : vector<8x32xf32> to vector<8x32xbf16>
    %c0_30 = arith.constant 0 : index
    %c64 = arith.constant 64 : index
    %c0_31 = arith.constant 0 : index
    %77 = vector.load %arg8[%c0_30, %c64, %c0_31] : memref<1x128x128xbf16, #tpu.memory_space<vmem>>, vector<1x32x128xbf16>
    %78 = vector.shape_cast %77 : vector<1x32x128xbf16> to vector<32x128xbf16>
    %cst_32 = arith.constant dense<0.000000e+00> : vector<8x128xf32>
    %79 = tpu.matmul %76, %78, %cst_32 {dimension_numbers = #tpu.dot_dimension_numbers<[1], [0], [0], [1], [0, 0, 1, 1], [], []>} : vector<8x32xbf16>, vector<32x128xbf16>, vector<8x128xf32> -> vector<8x128xf32>
    %80 = arith.addf %58, %79 : vector<8x128xf32>
    %81 = vector.extract_strided_slice %11 {offsets = [0, 96], sizes = [8, 32], strides = [1, 1]} : vector<16x384xf32> to vector<8x32xf32>
    %82 = vector.extract_strided_slice %11 {offsets = [0, 224], sizes = [8, 32], strides = [1, 1]} : vector<16x384xf32> to vector<8x32xf32>
    %83 = vector.extract_strided_slice %11 {offsets = [0, 352], sizes = [8, 32], strides = [1, 1]} : vector<16x384xf32> to vector<8x32xf32>
    %84 = tpu.transpose %82, [1, 0] : vector<8x32xf32> -> vector<32x8xf32>
    %cst_33 = arith.constant dense<0.000000e+00> : vector<8x8xf32>
    %85 = tpu.matmul %81, %84, %cst_33 {dimension_numbers = #tpu.dot_dimension_numbers<[1], [0], [0], [1], [0, 0, 1, 1], [], []>} : vector<8x32xf32>, vector<32x8xf32>, vector<8x8xf32> -> vector<8x8xf32>
    %86 = arith.addf %85, %15 : vector<8x8xf32>
    %cst_34 = arith.constant dense<0xFF800000> : vector<8xf32>
    %87 = vector.multi_reduction <maximumf>, %86, %cst_34 [1] : vector<8x8xf32> to vector<8xf32>
    %88 = vector.shape_cast %87 : vector<8xf32> to vector<8x1xf32>
    %89 = vector.broadcast %88 : vector<8x1xf32> to vector<8x8xf32>
    %90 = arith.subf %86, %89 : vector<8x8xf32>
    %91 = math.exp %90 : vector<8x8xf32>
    %cst_35 = arith.constant dense<0.000000e+00> : vector<8xf32>
    %92 = vector.multi_reduction <add>, %91, %cst_35 [1] : vector<8x8xf32> to vector<8xf32>
    %93 = vector.shape_cast %92 : vector<8xf32> to vector<8x1xf32>
    %94 = tpu.reciprocal %93 {approx = true} : vector<8x1xf32> -> vector<8x1xf32>
    %95 = vector.broadcast %94 : vector<8x1xf32> to vector<8x8xf32>
    %96 = arith.mulf %91, %95 : vector<8x8xf32>
    %cst_36 = arith.constant dense<0.000000e+00> : vector<8x32xf32>
    %97 = tpu.matmul %96, %83, %cst_36 {dimension_numbers = #tpu.dot_dimension_numbers<[1], [0], [0], [1], [0, 0, 1, 1], [], []>} : vector<8x8xf32>, vector<8x32xf32>, vector<8x32xf32> -> vector<8x32xf32>
    %98 = arith.truncf %97 : vector<8x32xf32> to vector<8x32xbf16>
    %c0_37 = arith.constant 0 : index
    %c96 = arith.constant 96 : index
    %c0_38 = arith.constant 0 : index
    %99 = vector.load %arg8[%c0_37, %c96, %c0_38] : memref<1x128x128xbf16, #tpu.memory_space<vmem>>, vector<1x32x128xbf16>
    %100 = vector.shape_cast %99 : vector<1x32x128xbf16> to vector<32x128xbf16>
    %cst_39 = arith.constant dense<0.000000e+00> : vector<8x128xf32>
    %101 = tpu.matmul %98, %100, %cst_39 {dimension_numbers = #tpu.dot_dimension_numbers<[1], [0], [0], [1], [0, 0, 1, 1], [], []>} : vector<8x32xbf16>, vector<32x128xbf16>, vector<8x128xf32> -> vector<8x128xf32>
    %102 = arith.addf %80, %101 : vector<8x128xf32>
    %c1 = arith.constant 1 : index
    %c0_40 = arith.constant 0 : index
    %c0_41 = arith.constant 0 : index
    %103 = vector.load %arg3[%c1, %c0_40, %c0_41] : memref<2x1x8xf32, #tpu.memory_space<vmem>>, vector<1x1x8xf32>
    %104 = vector.shape_cast %103 : vector<1x1x8xf32> to vector<1x8xf32>
    %105 = vector.shape_cast %104 : vector<1x8xf32> to vector<1x8xf32>
    %106 = vector.broadcast %105 : vector<1x8xf32> to vector<8x8xf32>
    %107 = vector.extract_strided_slice %11 {offsets = [8, 0], sizes = [8, 32], strides = [1, 1]} : vector<16x384xf32> to vector<8x32xf32>
    %108 = vector.extract_strided_slice %11 {offsets = [8, 128], sizes = [8, 32], strides = [1, 1]} : vector<16x384xf32> to vector<8x32xf32>
    %109 = vector.extract_strided_slice %11 {offsets = [8, 256], sizes = [8, 32], strides = [1, 1]} : vector<16x384xf32> to vector<8x32xf32>
    %110 = tpu.transpose %108, [1, 0] : vector<8x32xf32> -> vector<32x8xf32>
    %cst_42 = arith.constant dense<0.000000e+00> : vector<8x8xf32>
    %111 = tpu.matmul %107, %110, %cst_42 {dimension_numbers = #tpu.dot_dimension_numbers<[1], [0], [0], [1], [0, 0, 1, 1], [], []>} : vector<8x32xf32>, vector<32x8xf32>, vector<8x8xf32> -> vector<8x8xf32>
    %112 = arith.addf %111, %106 : vector<8x8xf32>
    %cst_43 = arith.constant dense<0xFF800000> : vector<8xf32>
    %113 = vector.multi_reduction <maximumf>, %112, %cst_43 [1] : vector<8x8xf32> to vector<8xf32>
    %114 = vector.shape_cast %113 : vector<8xf32> to vector<8x1xf32>
    %115 = vector.broadcast %114 : vector<8x1xf32> to vector<8x8xf32>
    %116 = arith.subf %112, %115 : vector<8x8xf32>
    %117 = math.exp %116 : vector<8x8xf32>
    %cst_44 = arith.constant dense<0.000000e+00> : vector<8xf32>
    %118 = vector.multi_reduction <add>, %117, %cst_44 [1] : vector<8x8xf32> to vector<8xf32>
    %119 = vector.shape_cast %118 : vector<8xf32> to vector<8x1xf32>
    %120 = tpu.reciprocal %119 {approx = true} : vector<8x1xf32> -> vector<8x1xf32>
    %121 = vector.broadcast %120 : vector<8x1xf32> to vector<8x8xf32>
    %122 = arith.mulf %117, %121 : vector<8x8xf32>
    %cst_45 = arith.constant dense<0.000000e+00> : vector<8x32xf32>
    %123 = tpu.matmul %122, %109, %cst_45 {dimension_numbers = #tpu.dot_dimension_numbers<[1], [0], [0], [1], [0, 0, 1, 1], [], []>} : vector<8x8xf32>, vector<8x32xf32>, vector<8x32xf32> -> vector<8x32xf32>
    %124 = arith.truncf %123 : vector<8x32xf32> to vector<8x32xbf16>
    %c0_46 = arith.constant 0 : index
    %c0_47 = arith.constant 0 : index
    %c0_48 = arith.constant 0 : index
    %125 = vector.load %arg8[%c0_46, %c0_47, %c0_48] : memref<1x128x128xbf16, #tpu.memory_space<vmem>>, vector<1x32x128xbf16>
    %126 = vector.shape_cast %125 : vector<1x32x128xbf16> to vector<32x128xbf16>
    %cst_49 = arith.constant dense<0.000000e+00> : vector<8x128xf32>
    %127 = tpu.matmul %124, %126, %cst_49 {dimension_numbers = #tpu.dot_dimension_numbers<[1], [0], [0], [1], [0, 0, 1, 1], [], []>} : vector<8x32xbf16>, vector<32x128xbf16>, vector<8x128xf32> -> vector<8x128xf32>
    %128 = vector.extract_strided_slice %11 {offsets = [8, 32], sizes = [8, 32], strides = [1, 1]} : vector<16x384xf32> to vector<8x32xf32>
    %129 = vector.extract_strided_slice %11 {offsets = [8, 160], sizes = [8, 32], strides = [1, 1]} : vector<16x384xf32> to vector<8x32xf32>
    %130 = vector.extract_strided_slice %11 {offsets = [8, 288], sizes = [8, 32], strides = [1, 1]} : vector<16x384xf32> to vector<8x32xf32>
    %131 = tpu.transpose %129, [1, 0] : vector<8x32xf32> -> vector<32x8xf32>
    %cst_50 = arith.constant dense<0.000000e+00> : vector<8x8xf32>
    %132 = tpu.matmul %128, %131, %cst_50 {dimension_numbers = #tpu.dot_dimension_numbers<[1], [0], [0], [1], [0, 0, 1, 1], [], []>} : vector<8x32xf32>, vector<32x8xf32>, vector<8x8xf32> -> vector<8x8xf32>
    %133 = arith.addf %132, %106 : vector<8x8xf32>
    %cst_51 = arith.constant dense<0xFF800000> : vector<8xf32>
    %134 = vector.multi_reduction <maximumf>, %133, %cst_51 [1] : vector<8x8xf32> to vector<8xf32>
    %135 = vector.shape_cast %134 : vector<8xf32> to vector<8x1xf32>
    %136 = vector.broadcast %135 : vector<8x1xf32> to vector<8x8xf32>
    %137 = arith.subf %133, %136 : vector<8x8xf32>
    %138 = math.exp %137 : vector<8x8xf32>
    %cst_52 = arith.constant dense<0.000000e+00> : vector<8xf32>
    %139 = vector.multi_reduction <add>, %138, %cst_52 [1] : vector<8x8xf32> to vector<8xf32>
    %140 = vector.shape_cast %139 : vector<8xf32> to vector<8x1xf32>
    %141 = tpu.reciprocal %140 {approx = true} : vector<8x1xf32> -> vector<8x1xf32>
    %142 = vector.broadcast %141 : vector<8x1xf32> to vector<8x8xf32>
    %143 = arith.mulf %138, %142 : vector<8x8xf32>
    %cst_53 = arith.constant dense<0.000000e+00> : vector<8x32xf32>
    %144 = tpu.matmul %143, %130, %cst_53 {dimension_numbers = #tpu.dot_dimension_numbers<[1], [0], [0], [1], [0, 0, 1, 1], [], []>} : vector<8x8xf32>, vector<8x32xf32>, vector<8x32xf32> -> vector<8x32xf32>
    %145 = arith.truncf %144 : vector<8x32xf32> to vector<8x32xbf16>
    %c0_54 = arith.constant 0 : index
    %c32_55 = arith.constant 32 : index
    %c0_56 = arith.constant 0 : index
    %146 = vector.load %arg8[%c0_54, %c32_55, %c0_56] : memref<1x128x128xbf16, #tpu.memory_space<vmem>>, vector<1x32x128xbf16>
    %147 = vector.shape_cast %146 : vector<1x32x128xbf16> to vector<32x128xbf16>
    %cst_57 = arith.constant dense<0.000000e+00> : vector<8x128xf32>
    %148 = tpu.matmul %145, %147, %cst_57 {dimension_numbers = #tpu.dot_dimension_numbers<[1], [0], [0], [1], [0, 0, 1, 1], [], []>} : vector<8x32xbf16>, vector<32x128xbf16>, vector<8x128xf32> -> vector<8x128xf32>
    %149 = arith.addf %127, %148 : vector<8x128xf32>
    %150 = vector.extract_strided_slice %11 {offsets = [8, 64], sizes = [8, 32], strides = [1, 1]} : vector<16x384xf32> to vector<8x32xf32>
    %151 = vector.extract_strided_slice %11 {offsets = [8, 192], sizes = [8, 32], strides = [1, 1]} : vector<16x384xf32> to vector<8x32xf32>
    %152 = vector.extract_strided_slice %11 {offsets = [8, 320], sizes = [8, 32], strides = [1, 1]} : vector<16x384xf32> to vector<8x32xf32>
    %153 = tpu.transpose %151, [1, 0] : vector<8x32xf32> -> vector<32x8xf32>
    %cst_58 = arith.constant dense<0.000000e+00> : vector<8x8xf32>
    %154 = tpu.matmul %150, %153, %cst_58 {dimension_numbers = #tpu.dot_dimension_numbers<[1], [0], [0], [1], [0, 0, 1, 1], [], []>} : vector<8x32xf32>, vector<32x8xf32>, vector<8x8xf32> -> vector<8x8xf32>
    %155 = arith.addf %154, %106 : vector<8x8xf32>
    %cst_59 = arith.constant dense<0xFF800000> : vector<8xf32>
    %156 = vector.multi_reduction <maximumf>, %155, %cst_59 [1] : vector<8x8xf32> to vector<8xf32>
    %157 = vector.shape_cast %156 : vector<8xf32> to vector<8x1xf32>
    %158 = vector.broadcast %157 : vector<8x1xf32> to vector<8x8xf32>
    %159 = arith.subf %155, %158 : vector<8x8xf32>
    %160 = math.exp %159 : vector<8x8xf32>
    %cst_60 = arith.constant dense<0.000000e+00> : vector<8xf32>
    %161 = vector.multi_reduction <add>, %160, %cst_60 [1] : vector<8x8xf32> to vector<8xf32>
    %162 = vector.shape_cast %161 : vector<8xf32> to vector<8x1xf32>
    %163 = tpu.reciprocal %162 {approx = true} : vector<8x1xf32> -> vector<8x1xf32>
    %164 = vector.broadcast %163 : vector<8x1xf32> to vector<8x8xf32>
    %165 = arith.mulf %160, %164 : vector<8x8xf32>
    %cst_61 = arith.constant dense<0.000000e+00> : vector<8x32xf32>
    %166 = tpu.matmul %165, %152, %cst_61 {dimension_numbers = #tpu.dot_dimension_numbers<[1], [0], [0], [1], [0, 0, 1, 1], [], []>} : vector<8x8xf32>, vector<8x32xf32>, vector<8x32xf32> -> vector<8x32xf32>
    %167 = arith.truncf %166 : vector<8x32xf32> to vector<8x32xbf16>
    %c0_62 = arith.constant 0 : index
    %c64_63 = arith.constant 64 : index
    %c0_64 = arith.constant 0 : index
    %168 = vector.load %arg8[%c0_62, %c64_63, %c0_64] : memref<1x128x128xbf16, #tpu.memory_space<vmem>>, vector<1x32x128xbf16>
    %169 = vector.shape_cast %168 : vector<1x32x128xbf16> to vector<32x128xbf16>
    %cst_65 = arith.constant dense<0.000000e+00> : vector<8x128xf32>
    %170 = tpu.matmul %167, %169, %cst_65 {dimension_numbers = #tpu.dot_dimension_numbers<[1], [0], [0], [1], [0, 0, 1, 1], [], []>} : vector<8x32xbf16>, vector<32x128xbf16>, vector<8x128xf32> -> vector<8x128xf32>
    %171 = arith.addf %149, %170 : vector<8x128xf32>
    %172 = vector.extract_strided_slice %11 {offsets = [8, 96], sizes = [8, 32], strides = [1, 1]} : vector<16x384xf32> to vector<8x32xf32>
    %173 = vector.extract_strided_slice %11 {offsets = [8, 224], sizes = [8, 32], strides = [1, 1]} : vector<16x384xf32> to vector<8x32xf32>
    %174 = vector.extract_strided_slice %11 {offsets = [8, 352], sizes = [8, 32], strides = [1, 1]} : vector<16x384xf32> to vector<8x32xf32>
    %175 = tpu.transpose %173, [1, 0] : vector<8x32xf32> -> vector<32x8xf32>
    %cst_66 = arith.constant dense<0.000000e+00> : vector<8x8xf32>
    %176 = tpu.matmul %172, %175, %cst_66 {dimension_numbers = #tpu.dot_dimension_numbers<[1], [0], [0], [1], [0, 0, 1, 1], [], []>} : vector<8x32xf32>, vector<32x8xf32>, vector<8x8xf32> -> vector<8x8xf32>
    %177 = arith.addf %176, %106 : vector<8x8xf32>
    %cst_67 = arith.constant dense<0xFF800000> : vector<8xf32>
    %178 = vector.multi_reduction <maximumf>, %177, %cst_67 [1] : vector<8x8xf32> to vector<8xf32>
    %179 = vector.shape_cast %178 : vector<8xf32> to vector<8x1xf32>
    %180 = vector.broadcast %179 : vector<8x1xf32> to vector<8x8xf32>
    %181 = arith.subf %177, %180 : vector<8x8xf32>
    %182 = math.exp %181 : vector<8x8xf32>
    %cst_68 = arith.constant dense<0.000000e+00> : vector<8xf32>
    %183 = vector.multi_reduction <add>, %182, %cst_68 [1] : vector<8x8xf32> to vector<8xf32>
    %184 = vector.shape_cast %183 : vector<8xf32> to vector<8x1xf32>
    %185 = tpu.reciprocal %184 {approx = true} : vector<8x1xf32> -> vector<8x1xf32>
    %186 = vector.broadcast %185 : vector<8x1xf32> to vector<8x8xf32>
    %187 = arith.mulf %182, %186 : vector<8x8xf32>
    %cst_69 = arith.constant dense<0.000000e+00> : vector<8x32xf32>
    %188 = tpu.matmul %187, %174, %cst_69 {dimension_numbers = #tpu.dot_dimension_numbers<[1], [0], [0], [1], [0, 0, 1, 1], [], []>} : vector<8x8xf32>, vector<8x32xf32>, vector<8x32xf32> -> vector<8x32xf32>
    %189 = arith.truncf %188 : vector<8x32xf32> to vector<8x32xbf16>
    %c0_70 = arith.constant 0 : index
    %c96_71 = arith.constant 96 : index
    %c0_72 = arith.constant 0 : index
    %190 = vector.load %arg8[%c0_70, %c96_71, %c0_72] : memref<1x128x128xbf16, #tpu.memory_space<vmem>>, vector<1x32x128xbf16>
    %191 = vector.shape_cast %190 : vector<1x32x128xbf16> to vector<32x128xbf16>
    %cst_73 = arith.constant dense<0.000000e+00> : vector<8x128xf32>
    %192 = tpu.matmul %189, %191, %cst_73 {dimension_numbers = #tpu.dot_dimension_numbers<[1], [0], [0], [1], [0, 0, 1, 1], [], []>} : vector<8x32xbf16>, vector<32x128xbf16>, vector<8x128xf32> -> vector<8x128xf32>
    %193 = arith.addf %171, %192 : vector<8x128xf32>
    %194 = tpu.concatenate %102, %193 in 0 : vector<8x128xf32>, vector<8x128xf32> -> vector<16x128xf32>
    %c0_74 = arith.constant 0 : index
    %c0_75 = arith.constant 0 : index
    %c0_76 = arith.constant 0 : index
    %195 = vector.load %arg9[%c0_74, %c0_75, %c0_76] : memref<1x1x128xf32, #tpu.memory_space<vmem>>, vector<1x1x128xf32>
    %196 = vector.shape_cast %195 : vector<1x1x128xf32> to vector<1x128xf32>
    %197 = vector.broadcast %196 : vector<1x128xf32> to vector<16x128xf32>
    %198 = arith.addf %194, %197 : vector<16x128xf32>
    %199 = arith.addf %198, %3 : vector<16x128xf32>
    %c0_77 = arith.constant 0 : index
    %c0_78 = arith.constant 0 : index
    %c0_79 = arith.constant 0 : index
    %200 = vector.load %arg10[%c0_77, %c0_78, %c0_79] : memref<1x1x128xf32, #tpu.memory_space<vmem>>, vector<1x1x128xf32>
    %201 = vector.shape_cast %200 : vector<1x1x128xf32> to vector<1x128xf32>
    %c0_80 = arith.constant 0 : index
    %c0_81 = arith.constant 0 : index
    %c0_82 = arith.constant 0 : index
    %202 = vector.load %arg11[%c0_80, %c0_81, %c0_82] : memref<1x1x128xf32, #tpu.memory_space<vmem>>, vector<1x1x128xf32>
    %203 = vector.shape_cast %202 : vector<1x1x128xf32> to vector<1x128xf32>
    %cst_83 = arith.constant dense<0.000000e+00> : vector<16xf32>
    %204 = vector.multi_reduction <add>, %199, %cst_83 [1] : vector<16x128xf32> to vector<16xf32>
    %205 = vector.shape_cast %204 : vector<16xf32> to vector<16x1xf32>
    %cst_84 = arith.constant 1.280000e+02 : f32
    %206 = vector.broadcast %cst_84 : f32 to vector<16x1xf32>
    %207 = arith.divf %205, %206 : vector<16x1xf32>
    %208 = vector.broadcast %207 : vector<16x1xf32> to vector<16x128xf32>
    %209 = arith.subf %199, %208 : vector<16x128xf32>
    %210 = arith.mulf %209, %209 : vector<16x128xf32>
    %cst_85 = arith.constant dense<0.000000e+00> : vector<16xf32>
    %211 = vector.multi_reduction <add>, %210, %cst_85 [1] : vector<16x128xf32> to vector<16xf32>
    %212 = vector.shape_cast %211 : vector<16xf32> to vector<16x1xf32>
    %cst_86 = arith.constant 1.280000e+02 : f32
    %213 = vector.broadcast %cst_86 : f32 to vector<16x1xf32>
    %214 = arith.divf %212, %213 : vector<16x1xf32>
    %cst_87 = arith.constant 9.99999996E-13 : f32
    %215 = vector.broadcast %cst_87 : f32 to vector<16x1xf32>
    %216 = arith.addf %214, %215 : vector<16x1xf32>
    %217 = math.rsqrt %216 : vector<16x1xf32>
    %218 = vector.broadcast %217 : vector<16x1xf32> to vector<16x128xf32>
    %219 = arith.mulf %209, %218 : vector<16x128xf32>
    %220 = vector.broadcast %201 : vector<1x128xf32> to vector<16x128xf32>
    %221 = arith.mulf %219, %220 : vector<16x128xf32>
    %222 = vector.broadcast %203 : vector<1x128xf32> to vector<16x128xf32>
    %223 = arith.addf %221, %222 : vector<16x128xf32>
    %224 = arith.truncf %223 : vector<16x128xf32> to vector<16x128xbf16>
    %c0_88 = arith.constant 0 : index
    %c0_89 = arith.constant 0 : index
    %c0_90 = arith.constant 0 : index
    %225 = vector.load %arg12[%c0_88, %c0_89, %c0_90] : memref<1x128x256xbf16, #tpu.memory_space<vmem>>, vector<1x128x256xbf16>
    %226 = vector.shape_cast %225 : vector<1x128x256xbf16> to vector<128x256xbf16>
    %cst_91 = arith.constant dense<0.000000e+00> : vector<16x256xf32>
    %227 = tpu.matmul %224, %226, %cst_91 {dimension_numbers = #tpu.dot_dimension_numbers<[1], [0], [0], [1], [0, 0, 1, 1], [], []>} : vector<16x128xbf16>, vector<128x256xbf16>, vector<16x256xf32> -> vector<16x256xf32>
    %c0_92 = arith.constant 0 : index
    %c0_93 = arith.constant 0 : index
    %c0_94 = arith.constant 0 : index
    %228 = vector.load %arg13[%c0_92, %c0_93, %c0_94] : memref<1x1x256xf32, #tpu.memory_space<vmem>>, vector<1x1x256xf32>
    %229 = vector.shape_cast %228 : vector<1x1x256xf32> to vector<1x256xf32>
    %230 = vector.broadcast %229 : vector<1x256xf32> to vector<16x256xf32>
    %231 = arith.addf %227, %230 : vector<16x256xf32>
    %cst_95 = arith.constant 5.000000e-01 : f32
    %232 = vector.broadcast %cst_95 : f32 to vector<16x256xf32>
    %233 = arith.mulf %232, %231 : vector<16x256xf32>
    %cst_96 = arith.constant 4.471500e-02 : f32
    %234 = vector.broadcast %cst_96 : f32 to vector<16x256xf32>
    %235 = arith.mulf %234, %231 : vector<16x256xf32>
    %236 = arith.mulf %235, %231 : vector<16x256xf32>
    %237 = arith.mulf %236, %231 : vector<16x256xf32>
    %238 = arith.addf %231, %237 : vector<16x256xf32>
    %cst_97 = arith.constant 0.797884583 : f32
    %239 = vector.broadcast %cst_97 : f32 to vector<16x256xf32>
    %240 = arith.mulf %239, %238 : vector<16x256xf32>
    %241 = math.tanh %240 : vector<16x256xf32>
    %cst_98 = arith.constant 1.000000e+00 : f32
    %242 = vector.broadcast %cst_98 : f32 to vector<16x256xf32>
    %243 = arith.addf %242, %241 : vector<16x256xf32>
    %244 = arith.mulf %233, %243 : vector<16x256xf32>
    %245 = arith.truncf %244 : vector<16x256xf32> to vector<16x256xbf16>
    %c0_99 = arith.constant 0 : index
    %c0_100 = arith.constant 0 : index
    %c0_101 = arith.constant 0 : index
    %246 = vector.load %arg14[%c0_99, %c0_100, %c0_101] : memref<1x256x128xbf16, #tpu.memory_space<vmem>>, vector<1x256x128xbf16>
    %247 = vector.shape_cast %246 : vector<1x256x128xbf16> to vector<256x128xbf16>
    %cst_102 = arith.constant dense<0.000000e+00> : vector<16x128xf32>
    %248 = tpu.matmul %245, %247, %cst_102 {dimension_numbers = #tpu.dot_dimension_numbers<[1], [0], [0], [1], [0, 0, 1, 1], [], []>} : vector<16x256xbf16>, vector<256x128xbf16>, vector<16x128xf32> -> vector<16x128xf32>
    %c0_103 = arith.constant 0 : index
    %c0_104 = arith.constant 0 : index
    %c0_105 = arith.constant 0 : index
    %249 = vector.load %arg15[%c0_103, %c0_104, %c0_105] : memref<1x1x128xf32, #tpu.memory_space<vmem>>, vector<1x1x128xf32>
    %250 = vector.shape_cast %249 : vector<1x1x128xf32> to vector<1x128xf32>
    %251 = vector.broadcast %250 : vector<1x128xf32> to vector<16x128xf32>
    %252 = arith.addf %248, %251 : vector<16x128xf32>
    %253 = arith.addf %252, %223 : vector<16x128xf32>
    %c0_106 = arith.constant 0 : index
    %c0_107 = arith.constant 0 : index
    %c0_108 = arith.constant 0 : index
    %254 = vector.load %arg16[%c0_106, %c0_107, %c0_108] : memref<1x1x128xf32, #tpu.memory_space<vmem>>, vector<1x1x128xf32>
    %255 = vector.shape_cast %254 : vector<1x1x128xf32> to vector<1x128xf32>
    %c0_109 = arith.constant 0 : index
    %c0_110 = arith.constant 0 : index
    %c0_111 = arith.constant 0 : index
    %256 = vector.load %arg17[%c0_109, %c0_110, %c0_111] : memref<1x1x128xf32, #tpu.memory_space<vmem>>, vector<1x1x128xf32>
    %257 = vector.shape_cast %256 : vector<1x1x128xf32> to vector<1x128xf32>
    %cst_112 = arith.constant dense<0.000000e+00> : vector<16xf32>
    %258 = vector.multi_reduction <add>, %253, %cst_112 [1] : vector<16x128xf32> to vector<16xf32>
    %259 = vector.shape_cast %258 : vector<16xf32> to vector<16x1xf32>
    %cst_113 = arith.constant 1.280000e+02 : f32
    %260 = vector.broadcast %cst_113 : f32 to vector<16x1xf32>
    %261 = arith.divf %259, %260 : vector<16x1xf32>
    %262 = vector.broadcast %261 : vector<16x1xf32> to vector<16x128xf32>
    %263 = arith.subf %253, %262 : vector<16x128xf32>
    %264 = arith.mulf %263, %263 : vector<16x128xf32>
    %cst_114 = arith.constant dense<0.000000e+00> : vector<16xf32>
    %265 = vector.multi_reduction <add>, %264, %cst_114 [1] : vector<16x128xf32> to vector<16xf32>
    %266 = vector.shape_cast %265 : vector<16xf32> to vector<16x1xf32>
    %cst_115 = arith.constant 1.280000e+02 : f32
    %267 = vector.broadcast %cst_115 : f32 to vector<16x1xf32>
    %268 = arith.divf %266, %267 : vector<16x1xf32>
    %cst_116 = arith.constant 9.99999996E-13 : f32
    %269 = vector.broadcast %cst_116 : f32 to vector<16x1xf32>
    %270 = arith.addf %268, %269 : vector<16x1xf32>
    %271 = math.rsqrt %270 : vector<16x1xf32>
    %272 = vector.broadcast %271 : vector<16x1xf32> to vector<16x128xf32>
    %273 = arith.mulf %263, %272 : vector<16x128xf32>
    %274 = vector.broadcast %255 : vector<1x128xf32> to vector<16x128xf32>
    %275 = arith.mulf %273, %274 : vector<16x128xf32>
    %276 = vector.broadcast %257 : vector<1x128xf32> to vector<16x128xf32>
    %277 = arith.addf %275, %276 : vector<16x128xf32>
    %c0_117 = arith.constant 0 : index
    %c0_118 = arith.constant 0 : index
    %278 = vector.load %arg19[%c0_117, %c0_118] : memref<16x128xf32, #tpu.memory_space<vmem>>, vector<16x128xf32>
    tpu.vector_store %arg19[%c0_117, %c0_118], %277 {strides = array<i32>} : memref<16x128xf32, #tpu.memory_space<vmem>>, vector<16x128xf32>,
    %c1_i32 = arith.constant 1 : i32
    %279 = arith.cmpi eq, %arg1, %c1_i32 : i32
    %280 = arith.extui %279 : i1 to i32
    %c0_i32_119 = arith.constant 0 : i32
    %281 = arith.cmpi ne, %280, %c0_i32_119 : i32
    scf.if %281 {
      %282 = vector.shape_cast %277 : vector<16x128xf32> to vector<2x8x128xf32>
      %c0_120 = arith.constant 0 : index
      %c0_121 = arith.constant 0 : index
      %c0_122 = arith.constant 0 : index
      %283 = vector.load %arg18[%c0_120, %c0_121, %c0_122] : memref<2x8x128xf32, #tpu.memory_space<vmem>>, vector<2x8x128xf32>
      tpu.vector_store %arg18[%c0_120, %c0_121, %c0_122], %282 {strides = array<i32>} : memref<2x8x128xf32, #tpu.memory_space<vmem>>, vector<2x8x128xf32>,
    } else {
    }
    return
  }
  func.func @transform_0(%arg0: i32, %arg1: i32) -> (i32, i32, i32) {
    %c0_i32 = arith.constant 0 : i32
    %c0_i32_0 = arith.constant 0 : i32
    %c0_i32_1 = arith.constant 0 : i32
    return %arg0, %c0_i32, %c0_i32_0 : i32, i32, i32
  }
  func.func @transform_1(%arg0: i32, %arg1: i32) -> (i32, i32, i32) {
    %c0_i32 = arith.constant 0 : i32
    %c0_i32_0 = arith.constant 0 : i32
    %c0_i32_1 = arith.constant 0 : i32
    return %arg0, %c0_i32, %c0_i32_0 : i32, i32, i32
  }
  func.func @transform_2(%arg0: i32, %arg1: i32) -> (i32, i32) {
    %c0_i32 = arith.constant 0 : i32
    %c0_i32_0 = arith.constant 0 : i32
    %c0_i32_1 = arith.constant 0 : i32
    return %c0_i32, %c0_i32_0 : i32, i32
  }
  func.func @transform_3(%arg0: i32, %arg1: i32) -> (i32, i32) {
    %c0_i32 = arith.constant 0 : i32
    %c0_i32_0 = arith.constant 0 : i32
    %c0_i32_1 = arith.constant 0 : i32
    return %c0_i32, %c0_i32_0 : i32, i32
  }
  func.func @transform_4(%arg0: i32, %arg1: i32) -> (i32, i32, i32) {
    %c0_i32 = arith.constant 0 : i32
    %c0_i32_0 = arith.constant 0 : i32
    %c0_i32_1 = arith.constant 0 : i32
    return %arg1, %c0_i32, %c0_i32_0 : i32, i32, i32
  }
  func.func @transform_5(%arg0: i32, %arg1: i32) -> (i32, i32, i32) {
    %c0_i32 = arith.constant 0 : i32
    %c0_i32_0 = arith.constant 0 : i32
    %c0_i32_1 = arith.constant 0 : i32
    return %arg1, %c0_i32, %c0_i32_0 : i32, i32, i32
  }
  func.func @transform_6(%arg0: i32, %arg1: i32) -> (i32, i32, i32) {
    %c0_i32 = arith.constant 0 : i32
    %c0_i32_0 = arith.constant 0 : i32
    %c0_i32_1 = arith.constant 0 : i32
    return %arg1, %c0_i32, %c0_i32_0 : i32, i32, i32
  }
  func.func @transform_7(%arg0: i32, %arg1: i32) -> (i32, i32, i32) {
    %c0_i32 = arith.constant 0 : i32
    %c0_i32_0 = arith.constant 0 : i32
    %c0_i32_1 = arith.constant 0 : i32
    return %arg1, %c0_i32, %c0_i32_0 : i32, i32, i32
  }
  func.func @transform_8(%arg0: i32, %arg1: i32) -> (i32, i32, i32) {
    %c0_i32 = arith.constant 0 : i32
    %c0_i32_0 = arith.constant 0 : i32
    %c0_i32_1 = arith.constant 0 : i32
    return %arg1, %c0_i32, %c0_i32_0 : i32, i32, i32
  }
  func.func @transform_9(%arg0: i32, %arg1: i32) -> (i32, i32, i32) {
    %c0_i32 = arith.constant 0 : i32
    %c0_i32_0 = arith.constant 0 : i32
    %c0_i32_1 = arith.constant 0 : i32
    return %arg1, %c0_i32, %c0_i32_0 : i32, i32, i32
  }
  func.func @transform_10(%arg0: i32, %arg1: i32) -> (i32, i32, i32) {
    %c0_i32 = arith.constant 0 : i32
    %c0_i32_0 = arith.constant 0 : i32
    %c0_i32_1 = arith.constant 0 : i32
    return %arg1, %c0_i32, %c0_i32_0 : i32, i32, i32
  }
  func.func @transform_11(%arg0: i32, %arg1: i32) -> (i32, i32, i32) {
    %c0_i32 = arith.constant 0 : i32
    %c0_i32_0 = arith.constant 0 : i32
    %c0_i32_1 = arith.constant 0 : i32
    return %arg1, %c0_i32, %c0_i32_0 : i32, i32, i32
  }
  func.func @transform_12(%arg0: i32, %arg1: i32) -> (i32, i32, i32) {
    %c0_i32 = arith.constant 0 : i32
    %c0_i32_0 = arith.constant 0 : i32
    %c0_i32_1 = arith.constant 0 : i32
    return %arg1, %c0_i32, %c0_i32_0 : i32, i32, i32
  }
  func.func @transform_13(%arg0: i32, %arg1: i32) -> (i32, i32, i32) {
    %c0_i32 = arith.constant 0 : i32
    %c0_i32_0 = arith.constant 0 : i32
    %c0_i32_1 = arith.constant 0 : i32
    return %arg1, %c0_i32, %c0_i32_0 : i32, i32, i32
  }
  func.func @transform_14(%arg0: i32, %arg1: i32) -> (i32, i32, i32) {
    %c0_i32 = arith.constant 0 : i32
    %c0_i32_0 = arith.constant 0 : i32
    %c0_i32_1 = arith.constant 0 : i32
    return %arg1, %c0_i32, %c0_i32_0 : i32, i32, i32
  }
  func.func @transform_15(%arg0: i32, %arg1: i32) -> (i32, i32, i32) {
    %c0_i32 = arith.constant 0 : i32
    %c0_i32_0 = arith.constant 0 : i32
    %c0_i32_1 = arith.constant 0 : i32
    return %arg1, %c0_i32, %c0_i32_0 : i32, i32, i32
  }
  func.func @transform_16(%arg0: i32, %arg1: i32) -> (i32, i32, i32) {
    %c0_i32 = arith.constant 0 : i32
    %c0_i32_0 = arith.constant 0 : i32
    %c0_i32_1 = arith.constant 0 : i32
    return %arg0, %c0_i32, %c0_i32_0 : i32, i32, i32
  }
}

</mosaic_0001>

<bundles_post_ra>
// kernel: consert_model_forward.1
= control target key start
LH: loop header
LB: loop body
LE: loop exit
PB: predicated region body
PF: predicated region fallthrough
CT: control target
= control target key end

     0   :  { %s5025_s0 = inlined_call_operand.vmem [shape: f32[2,8,128], index: 0, kind: input, shape index: {}]   ;;  %s5026_s1 = inlined_call_operand.vmem [shape: f32[2,1,8], index: 1, kind: input, shape index: {}]   ;;  %s5027_s2 = inlined_call_operand.vmem [shape: f32[1,128], index: 2, kind: input, shape index: {}]   ;;  %s5028_s3 = inlined_call_operand.vmem [shape: f32[1,128], index: 3, kind: input, shape index: {}]   ;;  %s5029_s4 = inlined_call_operand.hbm [shape: bf16[2,128,384], index: 4, kind: input, shape index: {}]   ;;  %s5030_s5 = inlined_call_operand.vmem [shape: f32[2,1,384], index: 5, kind: input, shape index: {}]   ;;  %s5031_s6 = inlined_call_operand.vmem [shape: bf16[2,128,128], index: 6, kind: input, shape index: {}]   ;;  %s5032_s7 = inlined_call_operand.vmem [shape: f32[2,1,128], index: 7, kind: input, shape index: {}]   ;;  %s5033_s8 = inlined_call_operand.vmem [shape: f32[2,1,128], index: 8, kind: input, shape index: {}]   ;;  %s5034_s9 = inlined_call_operand.vmem [shape: f32[2,1,128], index: 9, kind: input, shape index: {}]   ;;  %s5035_s10 = inlined_call_operand.vmem [shape: bf16[2,128,256], index: 10, kind: input, shape index: {}]   ;;  %s5036_s11 = inlined_call_operand.vmem [shape: f32[2,1,256], index: 11, kind: input, shape index: {}]   ;;  %s5037_s12 = inlined_call_operand.hbm [shape: bf16[2,256,128], index: 12, kind: input, shape index: {}]   ;;  %s5038_s13 = inlined_call_operand.vmem [shape: f32[2,1,128], index: 13, kind: input, shape index: {}]   ;;  %s5039_s14 = inlined_call_operand.vmem [shape: f32[2,1,128], index: 14, kind: input, shape index: {}]   ;;  %s5040_s15 = inlined_call_operand.vmem [shape: f32[2,1,128], index: 15, kind: input, shape index: {}]   ;;  %s5041_s16 = inlined_call_operand.hbm [shape: f32[2,8,128], index: 16, kind: output, shape index: {}]  }
   0x1   :  { %5052 = sst [smem:[#allocation18_spill]] %s5025_s0 }
   0x2   :  { %5053 = sst [smem:[#allocation19_spill]] %s5026_s1 }
   0x3   :  { %5054 = sst [smem:[#allocation20_spill]] %s5027_s2 }
   0x4   :  { %5055 = sst [smem:[#allocation21_spill]] %s5028_s3 }
   0x5   :  { %5056 = sst [smem:[#allocation22_spill]] %s5029_s4 }
   0x6   :  { %5057 = sst [smem:[#allocation23_spill]] %s5030_s5 }
   0x7   :  { %5058 = sst [smem:[#allocation24_spill]] %s5031_s6 }
   0x8   :  { %5059 = sst [smem:[#allocation25_spill]] %s5037_s12 }
   0x9   :  { %5060 = sst [smem:[#allocation26_spill]] %s5041_s16 }
   0xa   :  { %21 = vsyncpa [#allocation4], 0 }
   0xb   :  { %23 = vsyncpa [#allocation4 + $0x1], 0 }
   0xc   :  { %24 = vsyncpa [#allocation7], 0 }
   0xd   :  { %26 = vsyncpa [#allocation7 + $0x1], 0 }
   0xe   :  { %27 = vsyncpa [#allocation5], 0  ;;  %s4385_s21 = smov 0   ;;  %s4387_s22 = smov 0  }
   0xf   :  { %s4389_s23 = smov 0   ;;  %s4391_s24 = smov 0  }
  0x10   :  { %s4393_s25 = smov 0   ;;  %s4395_s26 = smov 0  }
  0x11 LB: > { %5061 = sst [smem:[#allocation12_spill]] %s4267_s22  ;;  %s5045_s27 = sadd.s32 4294967295, %s4283_s26   ;;  %s4283_s26 = sphi %s4395_s26, %s33_s26   ;;  %s4279_s25 = sphi %s4393_s25, %s5093_s25   ;;  %s4275_s24 = sphi %s4391_s24, %s5092_s24   ;;  %s4271_s23 = sphi %s4389_s23, %s5091_s23   ;;  %s4267_s22 = sphi %s4387_s22, %s5090_s22   ;;  %s4263_s21 = sphi %s4385_s21, %s5089_s21  }
  0x12   : > { %5062 = sst [smem:[#allocation13_spill]] %s4271_s23  ;;  %s42_s28 = sadd.s32 1, %s4279_s25 }
  0x13   : > { %5063 = sst [smem:[#allocation14_spill]] %s4279_s25  ;;  %p43_p0 = scmp.ge.s32.totalorder %s42_s28, 2 }
  0x14   : > { %5064 = sst [smem:[#allocation15_spill]] %s4283_s26  ;;  %s146_s29 = sadd.s32 1, %s4271_s23 }
  0x15   : > { %p153_p1 = scmp.ne.s32.totalorder %s4271_s23, %s4267_s22  ;;  %p154_p2 = scmp.eq.s32.totalorder %s4283_s26, 0 }
  0x16   : > { %s5095_s28 = smov (%p43_p0, %s42_s28), 0  ;;  %p159_p4 = scmp.ne.s32.totalorder %s4267_s22, %s4263_s21 }
  0x17   : > { %5065 = sst [smem:[#allocation16_spill]] %s5095_s28  ;;  %p155_p3 = por %p154_p2, %p153_p1 }
  0x18   : > { %s143_s30 = ssub.s32 %s4279_s25, %s5095_s28  ;;  %p160_p5 = scmp.eq.s32.totalorder %s5045_s27, 0 }
  0x19   : > { %p144_p6 = scmp.eq.s32.totalorder %s143_s30, 0  ;;  %p3943_p8 = scmp.lt.s32.totalorder %s4283_s26, 2 }
  0x1a   : > { %p4426_p7 = por %p160_p5, %p159_p4  ;;  %s4435_s18 = sand.u32 1, %s4271_s23  }
  0x1b   : > { %s4432_s17 = scalar_select %p144_p6, %s4271_s23, %s146_s29  }
  0x1c   : > { %s5066_s0 = scalar_select %p4426_p7, 1, 0 }
  0x1d   : > { %5067 = sst [smem:[#allocation17_spill]] %s4432_s17  ;;  %s3925_s19 = smul.u32 3072, %s4279_s25 }
  0x1e   : > { %s3924_s20 = smul.u32 192, %s4435_s18  ;;  %s5068_s4 = sld [smem:[#allocation22_spill]] }
  0x1f   : > { %p4444_p9 = pnand %p3943_p8, %p155_p3  ;;  %s519_s28 = scalar_lea.sflag [#allocation4], %s4435_s18 }
  0x20   : > { %s522_s29 = scalar_lea.vmem [#allocation3], %s3924_s20 }
  0x21   : > { %s529_s27 = sshll.u32 %s522_s29, 4  ;;  %p4141_p11 = pneg %p4444_p9  ;;  %s4448_s27 = int_to_ptr.vmem [resolvable:$true] %s529_s27 }
  0x24   : > { %s4442_s21 = scalar_lea.hbm %s5068_s4, %s3925_s19  ;;  %s4144_s19 = scalar_lea.hbm %s5068_s4, 6144 }
  0x25   : > { %s4139_s17 = scalar_lea.hbm %s4442_s21, 3072  ;;  %p4145_p0 = scmp.lt.u32.totalorder %s4442_s21, %s5068_s4 }
  0x26   : > { %p4140_p10 = scmp.ne.s32.totalorder %s4442_s21, %s4139_s17  ;;  %p4146_p1 = scmp.lt.u32.totalorder %s4144_s19, %s4139_s17 }
  0x27   : > { %p4148_p3 = scmp.lt.u32.totalorder %s4139_s17, %s4442_s21 }
  0x28   : > { %p4142_p12 = pnand %p4141_p11, %p4140_p10  ;;  %p4147_p2 = por %p4146_p1, %p4145_p0 }
  0x2a   : > { %p4143_p13 = pneg %p4142_p12  ;;  %p4149_p4 = por %p4148_p3, %p4147_p2 }
  0x2c   : > { %p4150_p5 = pnand %p4149_p4, %p4143_p13 }
  0x2e   : > { %4153 = shalt.err (!%p4150_p5)
}
  0x2f   : > { %s4154_s20 = scalar_lea.vmem %s4448_s27, 3072  ;;  %s4285_s29 = smov [#allocation3]  }
  0x30   : > { %p4155_p6 = scmp.ne.s32.totalorder %s4448_s27, %s4154_s20  ;;  %s4159_s1 = sshll.u32 %s4285_s29, 4  ;;  %s4160_s1 = int_to_ptr.vmem [resolvable:$false] %s4159_s1 }
  0x31   : > { %s4161_s3 = scalar_lea.vmem %s4160_s1, 6144  ;;  %p4162_p12 = scmp.lt.s32.totalorder %s4448_s27, %s4160_s1 }
  0x32   : > { %p4157_p8 = pnand %p4155_p6, %p4141_p11  ;;  %p4163_p0 = scmp.lt.s32.totalorder %s4161_s3, %s4154_s20 }
  0x34   : > { %p4158_p10 = pneg %p4157_p8  ;;  %p4164_p1 = por %p4163_p0, %p4162_p12 }
  0x36   : > { %p4165_p2 = pnand %p4164_p1, %p4158_p10 }
  0x38   : > { %4168 = shalt.err (!%p4165_p2)
}
  0x39   : > { %s4286_s23 = smov 192   ;;  %s4287_s17 = smov 12  }
  0x3a   : > { %3939 = dma.hbm_to_vmem [thread:$0]  (!%p4444_p9), %s4442_s21, 3072, %s4448_s27, %s519_s28, %s4286_s23, %s4286_s23, %s4287_s17  }
  0x3b   : > { %p3550_p13 = scmp.ge.s32.totalorder %s4283_s26, 1  ;;  %p624_p3 = scmp.lt.s32.totalorder %s4283_s26, 3 }
  0x3c   : > { %s3547_s16 = sshll.u32 %s4435_s18, 7  ;;  %s3670_s20 = sshll.u32 %s4279_s25, 11 }
  0x3d   : > { %p4481_p4 = pnand %p3550_p13, %p624_p3  ;;  %s591_s29 = scalar_lea.vmem [#allocation6], %s3547_s16 }
  0x3e   : > { %s598_s1 = sshll.u32 %s591_s29, 4  ;;  %s5071_s12 = sld [smem:[#allocation25_spill]]  ;;  %s4491_s1 = int_to_ptr.vmem [resolvable:$true] %s598_s1 }
  0x3f   : > { %s588_s27 = scalar_lea.sflag [#allocation7], %s4435_s18 }
  0x44   : > { %s4489_s2 = scalar_lea.hbm %s5071_s12, %s3670_s20  ;;  %s4174_s17 = scalar_lea.hbm %s5071_s12, 4096 }
  0x45   : > { %s4169_s28 = scalar_lea.hbm %s4489_s2, 2048  ;;  %p4175_p10 = scmp.lt.u32.totalorder %s4489_s2, %s5071_s12 }
  0x46   : > { %p4170_p5 = scmp.ne.s32.totalorder %s4489_s2, %s4169_s28  ;;  %p4176_p12 = scmp.lt.u32.totalorder %s4174_s17, %s4169_s28 }
  0x47   : > { %p4178_p1 = scmp.lt.u32.totalorder %s4169_s28, %s4489_s2 }
  0x48   : > { %p4172_p6 = pnand %p4170_p5, %p4141_p11  ;;  %p4177_p0 = por %p4176_p12, %p4175_p10 }
  0x4a   : > { %p4173_p8 = pneg %p4172_p6  ;;  %p4179_p2 = por %p4178_p1, %p4177_p0 }
  0x4c   : > { %p4180_p13 = pnand %p4179_p2, %p4173_p8 }
  0x4e   : > { %4183 = shalt.err (!%p4180_p13)
}
  0x4f   : > { %s4184_s20 = scalar_lea.vmem %s4491_s1, 2048  ;;  %s4288_s29 = smov [#allocation6]  }
  0x50   : > { %p4185_p3 = scmp.ne.s32.totalorder %s4491_s1, %s4184_s20  ;;  %s4189_s3 = sshll.u32 %s4288_s29, 4  ;;  %s4190_s3 = int_to_ptr.vmem [resolvable:$false] %s4189_s3 }
  0x51   : > { %s4191_s21 = scalar_lea.vmem %s4190_s3, 4096  ;;  %p4192_p7 = scmp.lt.s32.totalorder %s4491_s1, %s4190_s3 }
  0x52   : > { %p4187_p5 = pnand %p4185_p3, %p4141_p11  ;;  %p4193_p10 = scmp.lt.s32.totalorder %s4191_s21, %s4184_s20 }
  0x54   : > { %p4188_p6 = pneg %p4187_p5  ;;  %p4194_p12 = por %p4193_p10, %p4192_p7 }
  0x56   : > { %p4195_p0 = pnand %p4194_p12, %p4188_p6 }
  0x58   : > { %4198 = shalt.err (!%p4195_p0)
}
  0x59   : > { %s4289_s28 = smov 64   ;;  %s4290_s23 = smov 4  }
  0x5a   : > { %3942 = dma.hbm_to_vmem [thread:$0]  (!%p4444_p9), %s4489_s2, 2048, %s4491_s1, %s588_s27, %s4289_s28, %s4289_s28, %s4290_s23  }
  0x5b   : > { %628 = sbr.rel (%p4481_p4) target bundleno = 6512 (0x1970), region = 84  ;;  %s630_s17 = sand.u32 (!%p4481_p4), 1, %s4267_s22  }
  0x5c   : > { %s3926_s4 = smul.u32 (!%p4481_p4), 192, %s630_s17  ;;  %s631_s16 = scalar_lea.sflag (!%p4481_p4), [#allocation4], %s630_s17 }
  0x5d   : > { %p5072_p7 = scmp.ne.s32.totalorder (!%p4481_p4), %s5066_s0, 0 }
  0x5e   : > { %s4522_s20 = scalar_lea.vmem (!%p4481_p4), [#allocation3], %s3926_s4 }
  0x62   : > { %4250 = dma.done.wait (%p5072_p7), %s631_s16, 3072  }
  0x63   : > { %4252 = vsyncadd (%p5072_p7), %s631_s16, 4294964224  ;;  %s3551_s29 = sshll.u32 %s630_s17, 7  ;;  %s640_s30 = scalar_lea.sflag [#allocation7], %s630_s17 }
  0x64   : > { %s4528_s18 = scalar_lea.vmem [#allocation6], %s3551_s29 }
  0x65   : > { %4254 = dma.done.wait (%p5072_p7), %s640_s30, 2048  }
  0x66   : > { %4256 = vsyncadd (%p5072_p7), %s640_s30, 4294965248  ;;  %p748_p9 = scmp.lt.s32.totalorder %s4275_s24, 1  ;;  %s5073_s6 = sld [smem:[#allocation24_spill]] }
  0x67   : > { %s5074_s5 = sld [smem:[#allocation23_spill]]  ;;  %p3557_p11 = scmp.ne.s32.totalorder %s4275_s24, 0 }
  0x68   : > { %s4536_s2 = scalar_select %p748_p9, %s4275_s24, 1 }
  0x69   : > { %789 = sbr.rel (%p3557_p11) target bundleno = 428 (0x1ac), region = 96  ;;  %s5075_s23 = sld [smem:[#allocation18_spill]] (!%p3557_p11) }
  0x6a   : > { %s3927_s19 = smul.u32 3, %s4536_s2  ;;  %s3671_s1 = sshll.u32 %s4536_s2, 6 }
  0x6b   : > { %s3672_s27 = sshll.u32 %s4536_s2, 7  ;;  %s3556_s21 = sshll.u32 %s4536_s2, 1 }
  0x6c   : > { %s4543_s3 = scalar_lea.vmem %s5073_s6, %s3671_s1  ;;  %s4566_s6 = scalar_lea.vmem %s5035_s10, %s3672_s27 }
  0x6d   : > { %s4552_s16 = scalar_lea.vmem %s5074_s5, %s3927_s19  ;;  %s4572_s19 = scalar_lea.vmem %s5036_s11, %s3556_s21 }
  0x6e   : > { %s777_s29 = scalar_lea.vmem %s5038_s13, %s4536_s2  ;;  %s780_s22 = scalar_lea.vmem %s5039_s14, %s4536_s2 }
  0x6f   : > { %s783_s1 = scalar_lea.vmem %s5040_s15, %s4536_s2  ;;  %s5076_s28 = smov (!%p3557_p11), %s5075_s23  ;;  %v790_v0 = vld [vmem:[%s5075_s23] sm:$0xff] (!%p3557_p11) }
  0x70   : > { %794 = vadd.xlane.f32.xlu0 %v790_v0  ;;  %v791_v1 = vld [vmem:[%s5076_s28 + $0x8] sm:$0xff]  ;;  %s5077_s26 = sld [smem:[#allocation20_spill]]  ;;  %s5078_s30 = sld [smem:[#allocation21_spill]] }
  0x74   : > { %796 = vadd.xlane.f32.xlu0 %v791_v1 }
  0x76   : > { %v3558_v17 = vld [vmem:[%s5077_s26] ss:$0 sm:$0xff] }
  0x77   : > { %v3559_v19 = vld [vmem:[%s5078_s30] ss:$0 sm:$0xff] }
  0xfd   : > { %v795_v2 = vpop.xlane.xlu0 %794 }
  0xfe   : > { %v799_v3 = vmul.f32 0.0078125, %v795_v2 }
 0x100   : > { %v801_v4 = vsub.f32 %v790_v0, %v799_v3 }
 0x101   : > { %v797_v5 = vpop.xlane.xlu0 %796 }
 0x102   : > { %v800_v6 = vmul.f32 0.0078125, %v797_v5  ;;  %v803_v7 = vmul.f32 %v801_v4, %v801_v4 }
 0x104   : > { %v802_v8 = vsub.f32 %v791_v1, %v800_v6  ;;  %805 = vadd.xlane.f32.xlu1 %v803_v7 }
 0x106   : > { %v804_v9 = vmul.f32 %v802_v8, %v802_v8 }
 0x108   : > { %807 = vadd.xlane.f32.xlu1 %v804_v9 }
 0x191   : > { %v806_v10 = vpop.xlane.xlu1 %805 }
 0x192   : > { %v809_v11 = vmul.f32 0.0078125, %v806_v10 }
 0x194   : > { %v811_v12 = vadd.f32 1e-12, %v809_v11 }
 0x195   : > { %v808_v13 = vpop.xlane.xlu1 %807 }
 0x196   : > { %4007 = vrsqrt.f32 %v811_v12  ;;  %v810_v14 = vmul.f32 0.0078125, %v808_v13 }
 0x198   : > { %v812_v15 = vadd.f32 1e-12, %v810_v14 }
 0x19a   : > { %4009 = vrsqrt.f32 %v812_v15 }
 0x1a0   : > { %v4008_v16 = vpop.eup %4007 }
 0x1a1   : > { %v815_v18 = vmul.f32 %v4008_v16, %v801_v4 }
 0x1a3   : > { %v823_v20 = vmul.f32 %v3558_v17, %v815_v18 }
 0x1a4   : > { %v4010_v21 = vpop.eup %4009 }
 0x1a5   : > { %v831_v22 = vadd.f32 %v3559_v19, %v823_v20  ;;  %v816_v23 = vmul.f32 %v4010_v21, %v802_v8 }
 0x1a7   : > { %833 = vst [vmem:[#allocation2] sm:$0xff] %v831_v22  ;;  %v824_v24 = vmul.f32 %v3558_v17, %v816_v23 }
 0x1a9   : > { %v832_v25 = vadd.f32 %v3559_v19, %v824_v24 }
 0x1ab   : > { %834 = vst [vmem:[#allocation2 + $0x8] sm:$0xff] %v832_v25 }
 0x1ac PF: > { %v4011_v26 = vld [vmem:[%s4522_s20 + $0x4] ss:$12 sps:$4 sm:$0xff]   ;;  %v4013_v27 = vld [vmem:[%s4522_s20] ss:$12 sps:$4 sm:$0xff]   ;;  %v4291_v28 = vmov 0   ;;  %v4292_v46 = vmov 0.0   ;;  %v872_v47 = vlaneseq  ;;  %s5080_s26 = scalar_lea.vmem %s5032_s7, %s4536_s2 }
 0x1ad   : > { %1047 = vmatprep.mubr.bf16.mxu0 %v4291_v28  ;;  %1015 = vmatprep.subr.bf16.mxu0 %v4011_v26  ;;  %v4014_v29 = vld [vmem:[%s4522_s20 + $0x1c] ss:$12 sps:$4 sm:$0xff]   ;;  %v4016_v30 = vld [vmem:[%s4522_s20 + $0x18] ss:$12 sps:$4 sm:$0xff]   ;;  %v4017_v31 = vld [vmem:[%s4522_s20 + $0x34] ss:$12 sps:$4 sm:$0xff]  }
 0x1ae   : > { %1016 = vmatpush1.bf16.msra.mxu0 %v4013_v27  ;;  %v4019_v32 = vld [vmem:[%s4522_s20 + $0x30] ss:$12 sps:$4 sm:$0xff]   ;;  %v4020_v33 = vld [vmem:[%s4522_s20 + $0x4c] ss:$12 sps:$4 sm:$0xff]   ;;  %v4022_v34 = vld [vmem:[%s4522_s20 + $0x48] ss:$12 sps:$4 sm:$0xff]   ;;  %3760 = vmatprep.subr.bf16.mxu1 %v4292_v46 }
 0x1af   : > { %1017 = vmatprep.subr.bf16.mxu0 %v4014_v29  ;;  %v4023_v35 = vld [vmem:[%s4522_s20 + $0x64] ss:$12 sps:$4 sm:$0xff]   ;;  %v4025_v36 = vld [vmem:[%s4522_s20 + $0x60] ss:$12 sps:$4 sm:$0xff]   ;;  %v4026_v37 = vld [vmem:[%s4522_s20 + $0x7c] ss:$12 sps:$4 sm:$0xff]  }
 0x1b0   : > { %v4028_v38 = vld [vmem:[%s4522_s20 + $0x78] ss:$12 sps:$4 sm:$0xff]   ;;  %v4029_v39 = vld [vmem:[%s4522_s20 + $0x94] ss:$12 sps:$4 sm:$0xff]   ;;  %v4031_v40 = vld [vmem:[%s4522_s20 + $0x90] ss:$12 sps:$4 sm:$0xff]  }
 0x1b1   : > { %v4032_v41 = vld [vmem:[%s4522_s20 + $0xac] ss:$12 sps:$4 sm:$0xff]   ;;  %v4034_v42 = vld [vmem:[%s4522_s20 + $0xa8] ss:$12 sps:$4 sm:$0xff]   ;;  %vm4293_vm0 = vmmov 0   ;;  %v4628_v48 = vshrl.u32 %v872_v47, 7 }
 0x1b2   : > { %1018 = vmatpush1.bf16.msra.mxu0 %v4016_v30  ;;  %v4616_v43 = vld [vmem:[#allocation2] sm:$0xff]  ;;  %v4618_v44 = vld [vmem:[#allocation2 + $0x8] sm:$0xff]  ;;  %3776 = vmatprep.mubr.msk.bf16.mxu1 %vm4293_vm0, %v4292_v46  ;;  %v4036_v53 = vld [vmem:[%s4522_s20 + $0x20] ss:$12 sps:$4 sm:$0xff]   ;;  %vm1106_vm1 = vcmask 261120   ;;  %s5079_s27 = sld [smem:[#allocation19_spill]] }
 0x1b3   : > { %1019 = vmatprep.subr.bf16.mxu0 %v4017_v31  ;;  %v837_v45 = vpack.c.bf16 %v4618_v44, %v4616_v43  ;;  %v878_v49 = vsub.s32 1, %v4628_v48  ;;  %v870_v50 = vld [vmem:[%s4552_s16] sm:$0x7]  ;;  %v4035_v51 = vld [vmem:[%s4522_s20 + $0x8] ss:$12 sps:$4 sm:$0xff]   ;;  %v874_v52 = vsub.s32 0, %v4628_v48 }
 0x1b4   : > { %3761 = vmatpush3.bf16.msra.mxu1 %v4035_v51  ;;  %v4037_v58 = vld [vmem:[%s4522_s20 + $0x38] ss:$12 sps:$4 sm:$0xff]   ;;  %s4294_s16 = smov 96   ;;  %v4038_v1 = vld [vmem:[%s4522_s20 + $0x50] ss:$12 sps:$4 sm:$0xff]   ;;  %vm1183_vm2 = vcmask 64512  }
 0x1b5   : > { %v879_v54 = vrot.slane %v870_v50, %v878_v49  ;;  %3762 = vmatprep.subr.bf16.mxu1 %v4292_v46  ;;  %v875_v56 = vrot.slane %v870_v50, %v874_v52  ;;  %v4039_v2 = vld [vmem:[%s4522_s20 + $0x68] ss:$12 sps:$4 sm:$0xff]   ;;  %v4040_v3 = vld [vmem:[%s4522_s20 + $0x80] ss:$12 sps:$4 sm:$0xff]   ;;  %v4041_v4 = vld [vmem:[%s4522_s20 + $0x98] ss:$12 sps:$4 sm:$0xff]  }
 0x1b6   : > { %1020 = vmatpush1.bf16.msra.mxu0 %v4019_v32  ;;  %v4042_v5 = vld [vmem:[%s4522_s20 + $0xb0] ss:$12 sps:$4 sm:$0xff]   ;;  %v882_v13 = vsub.s32 2, %v4628_v48  ;;  %s4295_s0 = smov 64   ;;  %s4296_s23 = smov 32  }
 0x1b7   : > { %1021 = vmatprep.subr.bf16.mxu0 %v4020_v33  ;;  %s5082_s20 = scalar_lea.vmem %s5034_s9, %s4536_s2  ;;  %p3665_p4 = scmp.ne.s32.totalorder %s4275_s24, 1 }
 0x1b8   : > { %3763 = vmatpush3.bf16.msra.mxu1 %v4036_v53  ;;  %v4682_v8 = vld [vmem:[%s5079_s27] ss:$0 sm:$0xff]  ;;  %v4687_v16 = vrot.slane %v870_v50, %v882_v13  ;;  %v4730_v50 = vld [vmem:[%s4543_s3 + $0x8] sm:$0xff]  }
 0x1b9   : > { %3764 = vmatprep.subr.bf16.mxu1 %v4292_v46 }
 0x1ba   : > { %1022 = vmatpush1.bf16.msra.mxu0 %v4022_v34 }
 0x1bb   : > { %1023 = vmatprep.subr.bf16.mxu0 %v4023_v35 }
 0x1bc   : > { %3765 = vmatpush3.bf16.msra.mxu1 %v4037_v58 }
 0x1bd   : > { %3766 = vmatprep.subr.bf16.mxu1 %v4292_v46 }
 0x1be   : > { %1024 = vmatpush1.bf16.msra.mxu0 %v4025_v36 }
 0x1bf   : > { %1025 = vmatprep.subr.bf16.mxu0 %v4026_v37 }
 0x1c0   : > { %3767 = vmatpush3.bf16.msra.mxu1 %v4038_v1 }
 0x1c1   : > { %3768 = vmatprep.subr.bf16.mxu1 %v4292_v46 }
 0x1c2   : > { %1026 = vmatpush1.bf16.msra.mxu0 %v4028_v38  ;;  %v4714_v38 = vld [vmem:[%s4543_s3 + $0x10] sm:$0xff]  }
 0x1c3   : > { %1027 = vmatprep.subr.bf16.mxu0 %v4029_v39  ;;  %v4718_v39 = vld [vmem:[%s4543_s3 + $0x18] sm:$0xff]  }
 0x1c4   : > { %3769 = vmatpush3.bf16.msra.mxu1 %v4039_v2 }
 0x1c5   : > { %3770 = vmatprep.subr.bf16.mxu1 %v4292_v46 }
 0x1c6   : > { %1028 = vmatpush1.bf16.msra.mxu0 %v4031_v40 }
 0x1c7   : > { %1029 = vmatprep.subr.bf16.mxu0 %v4032_v41 }
 0x1c8   : > { %3771 = vmatpush3.bf16.msra.mxu1 %v4040_v3 }
 0x1c9   : > { %3772 = vmatprep.subr.bf16.mxu1 %v4292_v46 }
 0x1ca   : > { %1030 = vmatpush1.bf16.msra.mxu0 %v4034_v42 }
 0x1cb   : > { %3780 = vmatprep.subr.mxu0 %v4292_v46 }
 0x1cc   : > { %3773 = vmatpush3.bf16.msra.mxu1 %v4041_v4 }
 0x1cd   : > { %1048 = vmatmul.mubr.bf16.vlgmr.msra.gmra.mrb[0].mxu0 %v837_v45  ;;  %3774 = vmatprep.subr.bf16.mxu1 %v4292_v46 }
 0x1ce   : > { %3782 = vmatprep.mubr.msk.f32.mxu0 %vm4293_vm0, %v4292_v46 }
 0x1d0   : > { %3775 = vmatpush3.bf16.msra.mxu1 %v4042_v5 }
 0x1d1   : > { %3785 = vmatprep.subr.mxu1 %v4292_v46 }
 0x1d3   : > { %3777 = vmatmul.mubr.bf16.vlgmr.msra.gmra.mrb[0].mxu1 %v837_v45  ;;  %v4725_v45 = vld [vmem:[%s4543_s3] sm:$0xff]  }
 0x1d4   : > { %3787 = vmatprep.mubr.msk.f32.mxu1 %vm4293_vm0, %v4292_v46 }
 0x2a0   : > { %v1049_v55 = vpop.f32.mrb[0].mxu0 }
 0x2a1   : > { %v1051_v57 = vpop.f32.mrb[1].mxu0  ;;  %v4652_v0 = vadd.f32 %v1049_v55, %v875_v56 }
 0x2a2   : > { %v4641_v59 = vadd.f32 %v1051_v57, %v879_v54  ;;  %v1053_v60 = vpop.f32.mrb[2].mxu0 }
 0x2a3   : > { %v4644_v61 = vadd.f32 %v1053_v60, %v875_v56  ;;  %v1055_v62 = vpop.f32.mrb[3].mxu0 }
 0x2a4   : > { %v4646_v63 = vadd.f32 %v1055_v62, %v879_v54  ;;  %1275 = vrot.lane.b32.xlu0 %v4641_v59, %s4294_s16  ;;  %3781 = vmatpush3.xpose.msk.msra.mxu0 %vm1106_vm1, %v4641_v59 }
 0x2a5   : > { %3790 = vmatprep.subr.mxu0 %v4292_v46 }
 0x2a6   : > { %v1092_v14 = vpop.f32.mrb[0].mxu1 }
 0x2a7   : > { %3783 = vmatmul.mubr.msk.f32.vlgmr.msra.gmra.mrb[4].mxu0 %vm1106_vm1, %v4652_v0  ;;  %v3778_v15 = vpop.f32.mrb[1].mxu1  ;;  %v4690_v17 = vadd.f32 %v1092_v14, %v4687_v16 }
 0x2a8   : > { %1273 = vrot.lane.b32.xlu0 %v4652_v0, %s4294_s16  ;;  %3792 = vmatprep.mubr.msk.f32.mxu0 %vm4293_vm0, %v4292_v46  ;;  %v4699_v27 = vpop.f32.mrb[2].mxu1 }
 0x2a9   : > { %3786 = vmatpush3.msra.mxu1 %v4690_v17  ;;  %v3779_v29 = vpop.f32.mrb[3].mxu1 }
 0x2aa   : > { %3795 = vmatprep.subr.mxu1 %v4292_v46 }
 0x316   : > { %v1276_v6 = vpop.permute.xlu0 %1275 }
 0x317   : > { %3791 = vmatpush3.xpose.msk.msra.mxu0 %vm1106_vm1, %v1276_v6 }
 0x318   : > { %3800 = vmatprep.subr.bf16.mxu0 %v4292_v46 }
 0x31a   : > { %v1274_v7 = vpop.permute.xlu0 %1273 }
 0x31b   : > { %3793 = vmatmul.mubr.msk.f32.vlgmr.msra.gmra.mrb[6].mxu0 %vm1106_vm1, %v1274_v7 }
 0x31c   : > { %3804 = vmatprep.mubr.msk.bf16.mxu0 %vm4293_vm0, %v4292_v46  ;;  %3801 = vmatpush3.bf16.msra.mxu0 %v4714_v38 }
 0x31d   : > { %3802 = vmatprep.subr.bf16.mxu0 %v4292_v46 }
 0x320   : > { %3803 = vmatpush3.bf16.msra.mxu0 %v4718_v39 }
 0x321   : > { %3816 = vmatprep.subr.mxu0 %v4292_v46 }
 0x37a   : > { %v1179_v9 = vpop.f32.mrb[4].mxu0 }
 0x37b   : > { %v1180_v10 = vadd.f32 %v4682_v8, %v1179_v9  ;;  %v3784_v11 = vpop.f32.mrb[5].mxu0 }
 0x37d   : > { %v1184_v12 = vsel %vm1183_vm2, %v1180_v10, -inf }
 0x37e   : > { %1185 = vmax.xlane.f32.xlu1 %v1184_v12 }
 0x3ee   : > { %v1347_v18 = vpop.f32.mrb[6].mxu0 }
 0x3ef   : > { %v1348_v19 = vadd.f32 %v4682_v8, %v1347_v18  ;;  %v3794_v20 = vpop.f32.mrb[7].mxu0 }
 0x3f1   : > { %v1351_v21 = vsel %vm1183_vm2, %v1348_v19, -inf }
 0x3f2   : > { %1352 = vmax.xlane.f32.xlu1 %v1351_v21  ;;  %v4755_v21 = vld [vmem:[%s4543_s3 + $0x20] sm:$0xff]  }
 0x40b   : > { %v1186_v22 = vpop.xlane.xlu1 %1185 }
 0x40c   : > { %v1187_v23 = vsub.f32 %v1180_v10, %v1186_v22 }
 0x40e   : > { %v1188_v24 = vmul.f32 1.442695, %v1187_v23 }
 0x410   : > { %4091 = vpow2.f32 %v1188_v24 }
 0x41a   : > { %v4092_v25 = vpop.eup %4091 }
 0x41b   : > { %v1190_v26 = vsel %vm1183_vm2, %v4092_v25, 0.0 }
 0x41c   : > { %1191 = vadd.xlane.f32.xlu0 %v1190_v26  ;;  %v4768_v26 = vld [vmem:[%s4543_s3 + $0x28] sm:$0xff]  }
 0x432   : > { %1643 = vrot.lane.b32.xlu0 %v4690_v17, %s4295_s0 }
 0x436   : > { %1782 = vrot.lane.b32.xlu0 %v4641_v59, %s4296_s23 }
 0x47f   : > { %v1353_v30 = vpop.xlane.xlu1 %1352 }
 0x480   : > { %v1354_v31 = vsub.f32 %v1348_v19, %v1353_v30 }
 0x482   : > { %v1355_v32 = vmul.f32 1.442695, %v1354_v31 }
 0x484   : > { %4093 = vpow2.f32 %v1355_v32 }
 0x48e   : > { %v4094_v33 = vpop.eup %4093 }
 0x48f   : > { %v1357_v34 = vsel %vm1183_vm2, %v4094_v33, 0.0 }
 0x490   : > { %1358 = vadd.xlane.f32.xlu1 %v1357_v34 }
 0x4a1   : > { %1363 = vrot.lane.b32.xlu1 %v4690_v17, %s4294_s16 }
 0x4a5   : > { %1556 = vrot.lane.b32.xlu1 %v4641_v59, %s4295_s0 }
 0x4a9   : > { %v1192_v35 = vpop.xlane.xlu0 %1191  ;;  %1554 = vrot.lane.b32.xlu1 %v4652_v0, %s4295_s0 }
 0x4aa   : > { %4095 = vrcp.f32 %v1192_v35 }
 0x4ad   : > { %v1644_v55 = vpop.permute.xlu0 %1643 }
 0x4b1   : > { %v1783_v22 = vpop.permute.xlu0 %1782 }
 0x4b4   : > { %v4096_v36 = vpop.eup %4095 }
 0x4b5   : > { %v1194_v37 = vmul.f32 %v4096_v36, %v4092_v25 }
 0x4b7   : > { %3788 = vmatmul.mubr.msk.f32.vlgmr.msra.gmra.mrb[4].mxu1 %vm1183_vm2, %v1194_v37 }
 0x4b8   : > { %3797 = vmatprep.mubr.msk.f32.mxu1 %vm4293_vm0, %v4292_v46 }
 0x51d   : > { %v1359_v40 = vpop.xlane.xlu1 %1358 }
 0x51e   : > { %4097 = vrcp.f32 %v1359_v40 }
 0x521   : > { %v1364_v41 = vpop.permute.xlu1 %1363 }
 0x522   : > { %3796 = vmatpush3.msra.mxu1 %v1364_v41 }
 0x523   : > { %3808 = vmatprep.subr.bf16.mxu1 %v4292_v46 }
 0x525   : > { %v1557_v59 = vpop.permute.xlu1 %1556 }
 0x528   : > { %v4098_v42 = vpop.eup %4097 }
 0x529   : > { %v1361_v47 = vmul.f32 %v4098_v42, %v4094_v33  ;;  %v1555_v60 = vpop.permute.xlu1 %1554 }
 0x52b   : > { %3798 = vmatmul.mubr.msk.f32.vlgmr.msra.gmra.mrb[6].mxu1 %vm1183_vm2, %v1361_v47  ;;  %v4783_v47 = vld [vmem:[%s4543_s3 + $0x30] sm:$0xff]  }
 0x52c   : > { %3809 = vmatpush3.bf16.msra.mxu1 %v4725_v45  ;;  %3812 = vmatprep.mubr.msk.bf16.mxu1 %vm4293_vm0, %v4292_v46 }
 0x52d   : > { %3810 = vmatprep.subr.bf16.mxu1 %v4292_v46 }
 0x530   : > { %3811 = vmatpush3.bf16.msra.mxu1 %v4730_v50 }
 0x531   : > { %3821 = vmatprep.subr.mxu1 %v4292_v46 }
 0x58a   : > { %v1264_v51 = vpop.f32.mrb[4].mxu1 }
 0x58b   : > { %v1268_v53 = vpack.c.bf16 %v1264_v51, %v1264_v51  ;;  %v3789_v54 = vpop.f32.mrb[5].mxu1 }
 0x58d   : > { %3813 = vmatmul.mubr.msk.bf16.vlgmr.msra.gmra.mrb[8].mxu1 %vm1106_vm1, %v1268_v53 }
 0x58e   : > { %3822 = vmatpush3.msra.mxu1 %v1644_v55  ;;  %3823 = vmatprep.mubr.msk.f32.mxu1 %vm4293_vm0, %v4292_v46 }
 0x58f   : > { %3834 = vmatprep.subr.mxu1 %v4292_v46 }
 0x5fe   : > { %v1435_v56 = vpop.f32.mrb[6].mxu1 }
 0x5ff   : > { %v1439_v57 = vpack.c.bf16 %v1435_v56, %v1435_v56  ;;  %v3799_v58 = vpop.f32.mrb[7].mxu1 }
 0x601   : > { %3805 = vmatmul.mubr.msk.bf16.vlgmr.msra.gmra.mrb[8].mxu0 %vm1106_vm1, %v1439_v57 }
 0x602   : > { %3817 = vmatpush3.xpose.msk.msra.mxu0 %vm1106_vm1, %v1557_v59  ;;  %3818 = vmatprep.mubr.msk.f32.mxu0 %vm4293_vm0, %v4292_v46  ;;  %v4796_v59 = vadd.f32 %v4699_v27, %v4687_v16  ;;  %v4812_v27 = vld [vmem:[%s5079_s27 + $0x1] ss:$0 sm:$0xff] }
 0x603   : > { %3826 = vmatprep.subr.bf16.mxu0 %v4292_v46 }
 0x609   : > { %3819 = vmatmul.mubr.msk.f32.vlgmr.msra.gmra.mrb[12].mxu0 %vm1106_vm1, %v1555_v60  ;;  %v4805_v60 = vld [vmem:[%s4543_s3 + $0x38] sm:$0xff]  }
 0x60a   : > { %3830 = vmatprep.mubr.msk.bf16.mxu0 %vm4293_vm0, %v4292_v46  ;;  %3827 = vmatpush3.bf16.msra.mxu0 %v4755_v21 }
 0x60b   : > { %3828 = vmatprep.subr.bf16.mxu0 %v4292_v46 }
 0x60e   : > { %3829 = vmatpush3.bf16.msra.mxu0 %v4768_v26 }
 0x60f   : > { %3844 = vmatprep.subr.bf16.mxu0 %v4292_v46 }
 0x660   : > { %v1548_v62 = vpop.f32.mrb[8].mxu1 }
 0x661   : > { %v3814_v1 = vpop.f32.mrb[9].mxu1 }
 0x662   : > { %v1551_v2 = vpop.f32.mrb[10].mxu1 }
 0x663   : > { %v3815_v3 = vpop.f32.mrb[11].mxu1 }
 0x6d4   : > { %v1493_v4 = vpop.f32.mrb[8].mxu0 }
 0x6d5   : > { %v1549_v5 = vadd.f32 %v1548_v62, %v1493_v4  ;;  %v3806_v6 = vpop.f32.mrb[9].mxu0 }
 0x6d6   : > { %v1496_v7 = vpop.f32.mrb[10].mxu0 }
 0x6d7   : > { %v3807_v9 = vpop.f32.mrb[11].mxu0 }
 0x6dc   : > { %v1628_v10 = vpop.f32.mrb[12].mxu0 }
 0x6dd   : > { %v1629_v11 = vadd.f32 %v4682_v8, %v1628_v10  ;;  %v3820_v12 = vpop.f32.mrb[13].mxu0 }
 0x6df   : > { %v1632_v13 = vsel %vm1183_vm2, %v1629_v11, -inf }
 0x6e0   : > { %1633 = vmax.xlane.f32.xlu1 %v1632_v13 }
 0x76d   : > { %v1634_v14 = vpop.xlane.xlu1 %1633 }
 0x76e   : > { %v1635_v15 = vsub.f32 %v1629_v11, %v1634_v14 }
 0x770   : > { %v1636_v18 = vmul.f32 1.442695, %v1635_v15 }
 0x772   : > { %4099 = vpow2.f32 %v1636_v18 }
 0x77c   : > { %v4100_v19 = vpop.eup %4099 }
 0x77d   : > { %v1638_v20 = vsel %vm1183_vm2, %v4100_v19, 0.0 }
 0x77e   : > { %1639 = vadd.xlane.f32.xlu0 %v1638_v20 }
 0x794   : > { %1780 = vrot.lane.b32.xlu0 %v4652_v0, %s4296_s23 }
 0x80b   : > { %v1640_v23 = vpop.xlane.xlu0 %1639 }
 0x80c   : > { %4101 = vrcp.f32 %v1640_v23 }
 0x80f   : > { %v1781_v0 = vpop.permute.xlu0 %1780 }
 0x816   : > { %v4102_v24 = vpop.eup %4101 }
 0x817   : > { %v1642_v25 = vmul.f32 %v4102_v24, %v4100_v19 }
 0x819   : > { %3824 = vmatmul.mubr.msk.f32.vlgmr.msra.gmra.mrb[12].mxu1 %vm1183_vm2, %v1642_v25 }
 0x81a   : > { %3835 = vmatpush3.xpose.msk.msra.mxu1 %vm1106_vm1, %v1783_v22  ;;  %3836 = vmatprep.mubr.msk.f32.mxu1 %vm4293_vm0, %v4292_v46 }
 0x81b   : > { %3839 = vmatprep.subr.mxu1 %v4292_v46 }
 0x81d   : > { %3837 = vmatmul.mubr.msk.f32.vlgmr.msra.gmra.mrb[14].mxu1 %vm1106_vm1, %v1781_v0 }
 0x81e   : > { %3841 = vmatprep.mubr.msk.f32.mxu1 %vm4293_vm0, %v4292_v46 }
 0x8ec   : > { %v1715_v29 = vpop.f32.mrb[12].mxu1 }
 0x8ed   : > { %v1719_v30 = vpack.c.bf16 %v1715_v29, %v1715_v29  ;;  %v3825_v31 = vpop.f32.mrb[13].mxu1 }
 0x8ef   : > { %3831 = vmatmul.mubr.msk.bf16.vlgmr.msra.gmra.mrb[16].mxu0 %vm1106_vm1, %v1719_v30 }
 0x8f0   : > { %v1854_v32 = vpop.f32.mrb[14].mxu1  ;;  %3848 = vmatprep.mubr.msk.bf16.mxu0 %vm4293_vm0, %v4292_v46  ;;  %3845 = vmatpush3.bf16.msra.mxu0 %v4783_v47 }
 0x8f1   : > { %v1855_v33 = vadd.f32 %v4682_v8, %v1854_v32  ;;  %v3838_v34 = vpop.f32.mrb[15].mxu1  ;;  %3846 = vmatprep.subr.bf16.mxu0 %v4292_v46 }
 0x8f3   : > { %v1858_v35 = vsel %vm1183_vm2, %v1855_v33, -inf }
 0x8f4   : > { %1859 = vmax.xlane.f32.xlu0 %v1858_v35  ;;  %3847 = vmatpush3.bf16.msra.mxu0 %v4805_v60 }
 0x8f5   : > { %3867 = vmatprep.subr.mxu0 %v4292_v46 }
 0x90a   : > { %2177 = vrot.lane.b32.xlu0 %v4646_v63, %s4294_s16 }
 0x981   : > { %v1860_v36 = vpop.xlane.xlu0 %1859 }
 0x982   : > { %v1861_v37 = vsub.f32 %v1855_v33, %v1860_v36 }
 0x984   : > { %v1862_v40 = vmul.f32 1.442695, %v1861_v37 }
 0x985   : > { %v2178_v19 = vpop.permute.xlu0 %2177 }
 0x986   : > { %4103 = vpow2.f32 %v1862_v40 }
 0x990   : > { %v4104_v41 = vpop.eup %4103 }
 0x991   : > { %v1864_v42 = vsel %vm1183_vm2, %v4104_v41, 0.0 }
 0x992   : > { %1865 = vadd.xlane.f32.xlu1 %v1864_v42 }
 0x9a3   : > { %1869 = vrot.lane.b32.xlu1 %v4690_v17, %s4296_s23 }
 0x9c2   : > { %v1773_v8 = vpop.f32.mrb[16].mxu0 }
 0x9c3   : > { %v1779_v51 = vadd.f32 %v1773_v8, %v1549_v5  ;;  %v3832_v53 = vpop.f32.mrb[17].mxu0 }
 0x9c4   : > { %v1776_v54 = vpop.f32.mrb[18].mxu0 }
 0x9c5   : > { %v3833_v55 = vpop.f32.mrb[19].mxu0 }
 0xa1f   : > { %v1866_v56 = vpop.xlane.xlu1 %1865 }
 0xa20   : > { %4105 = vrcp.f32 %v1866_v56 }
 0xa23   : > { %v1870_v57 = vpop.permute.xlu1 %1869 }
 0xa24   : > { %3840 = vmatpush3.msra.mxu1 %v1870_v57 }
 0xa25   : > { %3852 = vmatprep.subr.mxu1 %v4292_v46 }
 0xa2a   : > { %v4106_v58 = vpop.eup %4105 }
 0xa2b   : > { %v1868_v17 = vmul.f32 %v4106_v58, %v4104_v41 }
 0xa2d   : > { %3842 = vmatmul.mubr.msk.f32.vlgmr.msra.gmra.mrb[16].mxu1 %vm1183_vm2, %v1868_v17 }
 0xa2e   : > { %3853 = vmatpush3.xpose.msk.msra.mxu1 %vm1106_vm1, %v4646_v63  ;;  %3854 = vmatprep.mubr.msk.f32.mxu1 %vm4293_vm0, %v4292_v46 }
 0xa2f   : > { %3857 = vmatprep.subr.mxu1 %v4292_v46 }
 0xa31   : > { %3855 = vmatmul.mubr.msk.f32.vlgmr.msra.gmra.mrb[18].mxu1 %vm1106_vm1, %v4644_v61 }
 0xa32   : > { %3858 = vmatpush3.msra.mxu1 %v4796_v59  ;;  %3859 = vmatprep.mubr.msk.f32.mxu1 %vm4293_vm0, %v4292_v46 }
 0xa33   : > { %3862 = vmatprep.subr.mxu1 %v4292_v46 }
 0xb00   : > { %v1941_v62 = vpop.f32.mrb[16].mxu1 }
 0xb01   : > { %v1945_v1 = vpack.c.bf16 %v1941_v62, %v1941_v62  ;;  %v3843_v16 = vpop.f32.mrb[17].mxu1 }
 0xb03   : > { %3849 = vmatmul.mubr.msk.bf16.vlgmr.msra.gmra.mrb[20].mxu0 %vm1106_vm1, %v1945_v1 }
 0xb04   : > { %v2086_v2 = vpop.f32.mrb[18].mxu1  ;;  %3869 = vmatprep.mubr.msk.f32.mxu0 %vm4293_vm0, %v4292_v46 }
 0xb05   : > { %v2087_v3 = vadd.f32 %v4812_v27, %v2086_v2  ;;  %v3856_v4 = vpop.f32.mrb[19].mxu1 }
 0xb07   : > { %v2090_v5 = vsel %vm1183_vm2, %v2087_v3, -inf }
 0xb08   : > { %2091 = vmax.xlane.f32.xlu1 %v2090_v5 }
 0xb95   : > { %v2092_v6 = vpop.xlane.xlu1 %2091 }
 0xb96   : > { %v2093_v7 = vsub.f32 %v2087_v3, %v2092_v6 }
 0xb98   : > { %v2094_v9 = vmul.f32 1.442695, %v2093_v7 }
 0xb9a   : > { %4107 = vpow2.f32 %v2094_v9 }
 0xba4   : > { %v4108_v10 = vpop.eup %4107 }
 0xba5   : > { %v2096_v11 = vsel %vm1183_vm2, %v4108_v10, 0.0 }
 0xba6   : > { %2097 = vadd.xlane.f32.xlu0 %v2096_v11 }
 0xbbc   : > { %2175 = vrot.lane.b32.xlu0 %v4644_v61, %s4294_s16 }
 0xbd6   : > { %v1999_v12 = vpop.f32.mrb[20].mxu0 }
 0xbd7   : > { %v4822_v13 = vadd.f32 %v1999_v12, %v1779_v51  ;;  %v3850_v14 = vpop.f32.mrb[21].mxu0 }
 0xbd8   : > { %v2002_v15 = vpop.f32.mrb[22].mxu0 }
 0xbd9   : > { %v3851_v18 = vpop.f32.mrb[23].mxu0 }
 0xc33   : > { %v2098_v20 = vpop.xlane.xlu0 %2097 }
 0xc34   : > { %4109 = vrcp.f32 %v2098_v20 }
 0xc37   : > { %v2176_v24 = vpop.permute.xlu0 %2175 }
 0xc3e   : > { %v4110_v22 = vpop.eup %4109 }
 0xc3f   : > { %v2100_v23 = vmul.f32 %v4110_v22, %v4108_v10 }
 0xc41   : > { %3860 = vmatmul.mubr.msk.f32.vlgmr.msra.gmra.mrb[20].mxu1 %vm1183_vm2, %v2100_v23 }
 0xc42   : > { %3863 = vmatpush3.xpose.msk.msra.mxu1 %vm1106_vm1, %v2178_v19  ;;  %3864 = vmatprep.mubr.msk.f32.mxu1 %vm4293_vm0, %v4292_v46 }
 0xc43   : > { %3872 = vmatprep.subr.bf16.mxu1 %v4292_v46 }
 0xc45   : > { %3865 = vmatmul.mubr.msk.f32.vlgmr.msra.gmra.mrb[22].mxu1 %vm1106_vm1, %v2176_v24 }
 0xc46   : > { %3873 = vmatpush3.bf16.msra.mxu1 %v4714_v38  ;;  %3876 = vmatprep.mubr.msk.bf16.mxu1 %vm4293_vm0, %v4292_v46 }
 0xc47   : > { %3874 = vmatprep.subr.bf16.mxu1 %v4292_v46 }
 0xc4a   : > { %3875 = vmatpush3.bf16.msra.mxu1 %v4718_v39 }
 0xc4b   : > { %3888 = vmatprep.subr.mxu1 %v4292_v46 }
 0xd14   : > { %v2170_v25 = vpop.f32.mrb[20].mxu1 }
 0xd15   : > { %v3861_v0 = vpop.f32.mrb[21].mxu1  ;;  %v2174_v42 = vpack.c.bf16 %v2170_v25, %v2170_v25 }
 0xd18   : > { %v2249_v29 = vpop.f32.mrb[22].mxu1 }
 0xd19   : > { %v2250_v30 = vadd.f32 %v4812_v27, %v2249_v29  ;;  %v3866_v31 = vpop.f32.mrb[23].mxu1 }
 0xd1b   : > { %v2253_v32 = vsel %vm1183_vm2, %v2250_v30, -inf }
 0xd1c   : > { %2254 = vmax.xlane.f32.xlu1 %v2253_v32 }
 0xd2d   : > { %2265 = vrot.lane.b32.xlu1 %v4796_v59, %s4294_s16 }
 0xd31   : > { %2430 = vrot.lane.b32.xlu1 %v4646_v63, %s4295_s0 }
 0xd35   : > { %2428 = vrot.lane.b32.xlu1 %v4644_v61, %s4295_s0 }
 0xda9   : > { %v2255_v38 = vpop.xlane.xlu1 %2254 }
 0xdaa   : > { %v2256_v39 = vsub.f32 %v2250_v30, %v2255_v38 }
 0xdac   : > { %v2257_v33 = vmul.f32 1.442695, %v2256_v39 }
 0xdad   : > { %v2266_v34 = vpop.permute.xlu1 %2265 }
 0xdae   : > { %4111 = vpow2.f32 %v2257_v33  ;;  %3868 = vmatpush3.msra.mxu0 %v2266_v34 }
 0xdaf   : > { %3880 = vmatprep.subr.bf16.mxu0 %v4292_v46 }
 0xdb1   : > { %v2431_v53 = vpop.permute.xlu1 %2430 }
 0xdb5   : > { %v2429_v55 = vpop.permute.xlu1 %2428 }
 0xdb8   : > { %v4112_v35 = vpop.eup %4111 }
 0xdb9   : > { %v2259_v36 = vsel %vm1183_vm2, %v4112_v35, 0.0 }
 0xdba   : > { %2260 = vadd.xlane.f32.xlu0 %v2259_v36 }
 0xdd0   : > { %2517 = vrot.lane.b32.xlu0 %v4796_v59, %s4295_s0 }
 0xdd4   : > { %2640 = vrot.lane.b32.xlu0 %v4646_v63, %s4296_s23 }
 0xe47   : > { %v2261_v37 = vpop.xlane.xlu0 %2260 }
 0xe48   : > { %4113 = vrcp.f32 %v2261_v37 }
 0xe4b   : > { %v2518_v8 = vpop.permute.xlu0 %2517 }
 0xe4f   : > { %v2641_v10 = vpop.permute.xlu0 %2640 }
 0xe52   : > { %v4114_v40 = vpop.eup %4113 }
 0xe53   : > { %v2263_v41 = vmul.f32 %v4114_v40, %v4112_v35 }
 0xe55   : > { %3870 = vmatmul.mubr.msk.f32.vlgmr.msra.gmra.mrb[14].mxu0 %vm1183_vm2, %v2263_v41 }
 0xe56   : > { %3881 = vmatpush3.bf16.msra.mxu0 %v4725_v45  ;;  %3884 = vmatprep.mubr.msk.bf16.mxu0 %vm4293_vm0, %v4292_v46 }
 0xe57   : > { %3882 = vmatprep.subr.bf16.mxu0 %v4292_v46 }
 0xe5a   : > { %3883 = vmatpush3.bf16.msra.mxu0 %v4730_v50 }
 0xe5b   : > { %3893 = vmatprep.subr.mxu0 %v4292_v46 }
 0xe5d   : > { %3885 = vmatmul.mubr.msk.bf16.vlgmr.msra.gmra.mrb[24].mxu0 %vm1106_vm1, %v2174_v42 }
 0xe5e   : > { %3894 = vmatpush3.msra.mxu0 %v2518_v8  ;;  %3895 = vmatprep.mubr.msk.f32.mxu0 %vm4293_vm0, %v4292_v46 }
 0xe5f   : > { %3906 = vmatprep.subr.mxu0 %v4292_v46 }
 0xf28   : > { %v2337_v63 = vpop.f32.mrb[14].mxu0 }
 0xf29   : > { %v2341_v45 = vpack.c.bf16 %v2337_v63, %v2337_v63  ;;  %v3871_v51 = vpop.f32.mrb[15].mxu0 }
 0xf2b   : > { %3877 = vmatmul.mubr.msk.bf16.vlgmr.msra.gmra.mrb[24].mxu1 %vm1106_vm1, %v2341_v45 }
 0xf2c   : > { %3889 = vmatpush3.xpose.msk.msra.mxu1 %vm1106_vm1, %v2431_v53  ;;  %3890 = vmatprep.mubr.msk.f32.mxu1 %vm4293_vm0, %v4292_v46 }
 0xf2d   : > { %3898 = vmatprep.subr.bf16.mxu1 %v4292_v46 }
 0xf30   : > { %v2422_v50 = vpop.f32.mrb[24].mxu0 }
 0xf31   : > { %v3886_v54 = vpop.f32.mrb[25].mxu0 }
 0xf32   : > { %v2425_v56 = vpop.f32.mrb[26].mxu0 }
 0xf33   : > { %v3887_v57 = vpop.f32.mrb[27].mxu0  ;;  %3891 = vmatmul.mubr.msk.f32.vlgmr.msra.gmra.mrb[28].mxu1 %vm1106_vm1, %v2429_v55  ;;  %v4051_v55 = vld [vmem:[%s4566_s6] ss:$8 sps:$4 sm:$0xff]   ;;  %v4053_v56 = vld [vmem:[%s4566_s6 + $0x4] ss:$8 sps:$4 sm:$0xff]  }
 0xf34   : > { %3899 = vmatpush3.bf16.msra.mxu1 %v4755_v21  ;;  %3902 = vmatprep.mubr.msk.bf16.mxu1 %vm4293_vm0, %v4292_v46  ;;  %v4056_v57 = vld [vmem:[%s4566_s6 + $0x14] ss:$8 sps:$4 sm:$0xff]  }
 0xf35   : > { %3900 = vmatprep.subr.bf16.mxu1 %v4292_v46 }
 0xf38   : > { %3901 = vmatpush3.bf16.msra.mxu1 %v4768_v26 }
 0xf39   : > { %3916 = vmatprep.subr.bf16.mxu1 %v4292_v46 }
 0xffe   : > { %v2379_v58 = vpop.f32.mrb[24].mxu1 }
 0xfff   : > { %v2423_v17 = vadd.f32 %v2422_v50, %v2379_v58  ;;  %v3878_v62 = vpop.f32.mrb[25].mxu1  ;;  %v4054_v58 = vld [vmem:[%s4566_s6 + $0x10] ss:$8 sps:$4 sm:$0xff]  }
0x1000   : > { %v2382_v1 = vpop.f32.mrb[26].mxu1  ;;  %v4057_v62 = vld [vmem:[%s4566_s6 + $0x20] ss:$8 sps:$4 sm:$0xff]  }
0x1001   : > { %v3879_v16 = vpop.f32.mrb[27].mxu1 }
0x1006   : > { %v2502_v2 = vpop.f32.mrb[28].mxu1 }
0x1007   : > { %v2503_v3 = vadd.f32 %v4812_v27, %v2502_v2  ;;  %v3892_v4 = vpop.f32.mrb[29].mxu1 }
0x1008   : > { %v4060_v4 = vld [vmem:[%s4566_s6 + $0x30] ss:$8 sps:$4 sm:$0xff]  }
0x1009   : > { %v2506_v21 = vsel %vm1183_vm2, %v2503_v3, -inf }
0x100a   : > { %2507 = vmax.xlane.f32.xlu1 %v2506_v21  ;;  %v4065_v21 = vld [vmem:[%s4566_s6 + $0x44] ss:$8 sps:$4 sm:$0xff]  }
0x1097   : > { %v2508_v5 = vpop.xlane.xlu1 %2507 }
0x1098   : > { %v2509_v6 = vsub.f32 %v2503_v3, %v2508_v5  ;;  %v4062_v3 = vld [vmem:[%s4566_s6 + $0x34] ss:$8 sps:$4 sm:$0xff]   ;;  %v4063_v5 = vld [vmem:[%s4566_s6 + $0x40] ss:$8 sps:$4 sm:$0xff]  }
0x109a   : > { %v2510_v7 = vmul.f32 1.442695, %v2509_v6  ;;  %v4068_v6 = vld [vmem:[%s4566_s6 + $0x54] ss:$8 sps:$4 sm:$0xff]  }
0x109c   : > { %4115 = vpow2.f32 %v2510_v7  ;;  %v4066_v7 = vld [vmem:[%s4566_s6 + $0x50] ss:$8 sps:$4 sm:$0xff]  }
0x10a6   : > { %v4116_v9 = vpop.eup %4115 }
0x10a7   : > { %v2512_v26 = vsel %vm1183_vm2, %v4116_v9, 0.0 }
0x10a8   : > { %2513 = vadd.xlane.f32.xlu0 %v2512_v26  ;;  %v4069_v26 = vld [vmem:[%s4566_s6 + $0x60] ss:$8 sps:$4 sm:$0xff]  }
0x10be   : > { %2638 = vrot.lane.b32.xlu0 %v4644_v61, %s4296_s23 }
0x1135   : > { %v2514_v11 = vpop.xlane.xlu0 %2513 }
0x1136   : > { %4117 = vrcp.f32 %v2514_v11  ;;  %v4072_v11 = vld [vmem:[%s4566_s6 + $0x70] ss:$8 sps:$4 sm:$0xff]  }
0x1139   : > { %v2639_v15 = vpop.permute.xlu0 %2638 }
0x1140   : > { %v4118_v12 = vpop.eup %4117 }
0x1141   : > { %v2516_v14 = vmul.f32 %v4118_v12, %v4116_v9  ;;  %v4071_v9 = vld [vmem:[%s4566_s6 + $0x64] ss:$8 sps:$4 sm:$0xff]  }
0x1143   : > { %3896 = vmatmul.mubr.msk.f32.vlgmr.msra.gmra.mrb[28].mxu0 %vm1183_vm2, %v2516_v14 }
0x1144   : > { %3907 = vmatpush3.xpose.msk.msra.mxu0 %vm1106_vm1, %v2641_v10  ;;  %3908 = vmatprep.mubr.msk.f32.mxu0 %vm4293_vm0, %v4292_v46  ;;  %v4074_v10 = vld [vmem:[%s4566_s6 + $0x74] ss:$8 sps:$4 sm:$0xff]  }
0x1145   : > { %3911 = vmatprep.subr.mxu0 %v4292_v46 }
0x1147   : > { %3909 = vmatmul.mubr.msk.f32.vlgmr.msra.gmra.mrb[30].mxu0 %vm1106_vm1, %v2639_v15 }
0x1148   : > { %3913 = vmatprep.mubr.msk.f32.mxu0 %vm4293_vm0, %v4292_v46 }
0x1216   : > { %v2589_v61 = vpop.f32.mrb[28].mxu0 }
0x1217   : > { %v2593_v18 = vpack.c.bf16 %v2589_v61, %v2589_v61  ;;  %v3897_v19 = vpop.f32.mrb[29].mxu0 }
0x1219   : > { %3903 = vmatmul.mubr.msk.bf16.vlgmr.msra.gmra.mrb[32].mxu1 %vm1106_vm1, %v2593_v18 }
0x121a   : > { %v2712_v20 = vpop.f32.mrb[30].mxu0  ;;  %3917 = vmatpush3.bf16.msra.mxu1 %v4783_v47  ;;  %3920 = vmatprep.mubr.msk.bf16.mxu1 %vm4293_vm0, %v4292_v46  ;;  %v3627_v47 = vld [vmem:[%s5080_s26] ss:$0 sm:$0xff] }
0x121b   : > { %v2713_v22 = vadd.f32 %v4812_v27, %v2712_v20  ;;  %v3910_v23 = vpop.f32.mrb[31].mxu0  ;;  %3918 = vmatprep.subr.bf16.mxu1 %v4292_v46  ;;  %v2855_v25 = vadd.f32 %v3627_v47, %v4822_v13 }
0x121d   : > { %v2716_v24 = vsel %vm1183_vm2, %v2713_v22, -inf  ;;  %v2857_v27 = vadd.f32 %v2855_v25, %v4616_v43 }
0x121e   : > { %2717 = vmax.xlane.f32.xlu1 %v2716_v24  ;;  %3919 = vmatpush3.bf16.msra.mxu1 %v4805_v60 }
0x122f   : > { %2727 = vrot.lane.b32.xlu1 %v4796_v59, %s4296_s23 }
0x1253   : > { %2861 = vadd.xlane.f32.xlu1 %v2857_v27 }
0x12ab   : > { %v2718_v0 = vpop.xlane.xlu1 %2717 }
0x12ac   : > { %v2719_v46 = vsub.f32 %v2713_v22, %v2718_v0 }
0x12ae   : > { %v2720_v29 = vmul.f32 1.442695, %v2719_v46 }
0x12af   : > { %v2728_v30 = vpop.permute.xlu1 %2727 }
0x12b0   : > { %4119 = vpow2.f32 %v2720_v29  ;;  %3912 = vmatpush3.msra.mxu0 %v2728_v30 }
0x12b1   : > { %3009 = vmatprep.subr.bf16.mxu0 %v4053_v56 }
0x12ba   : > { %v4120_v60 = vpop.eup %4119 }
0x12bb   : > { %v2722_v31 = vsel %vm1183_vm2, %v4120_v60, 0.0 }
0x12bc   : > { %2723 = vadd.xlane.f32.xlu0 %v2722_v31  ;;  %v4076_v31 = vld [vmem:[%s4528_s18] sm:$0xff]  }
0x12e0   : > { %v2862_v40 = vpop.xlane.xlu1 %2861 }
0x12e1   : > { %v2866_v42 = vmul.f32 0.0078125, %v2862_v40  ;;  %v4088_v40 = vld [vmem:[%s4528_s18 + $0x30] sm:$0xff]  }
0x12ec   : > { %v2631_v59 = vpop.f32.mrb[32].mxu1 }
0x12ed   : > { %v2637_v32 = vadd.f32 %v2631_v59, %v2423_v17  ;;  %v3904_v38 = vpop.f32.mrb[33].mxu1  ;;  %v4059_v17 = vld [vmem:[%s4566_s6 + $0x24] ss:$8 sps:$4 sm:$0xff]   ;;  %s5081_s6 = scalar_lea.vmem %s5033_s8, %s4536_s2  ;;  %v4077_v59 = vld [vmem:[%s4528_s18 + $0x48] sm:$0xff]  }
0x12ee   : > { %v2634_v39 = vpop.f32.mrb[34].mxu1  ;;  %v3628_v23 = vld [vmem:[%s5081_s6] ss:$0 sm:$0xff] }
0x12ef   : > { %v3905_v33 = vpop.f32.mrb[35].mxu1  ;;  %v4079_v38 = vld [vmem:[%s4528_s18 + $0x50] sm:$0xff]  }
0x12f0   : > { %v4080_v39 = vld [vmem:[%s4528_s18 + $0x10] sm:$0xff]   ;;  %v4081_v33 = vld [vmem:[%s4528_s18 + $0x58] sm:$0xff]  }
0x1349   : > { %v2724_v34 = vpop.xlane.xlu0 %2723 }
0x134a   : > { %4121 = vrcp.f32 %v2724_v34  ;;  %v4082_v34 = vld [vmem:[%s4528_s18 + $0x18] sm:$0xff]  }
0x1354   : > { %v4122_v13 = vpop.eup %4121 }
0x1355   : > { %v2726_v43 = vmul.f32 %v4122_v13, %v4120_v60  ;;  %v4075_v60 = vld [vmem:[%s4528_s18 + $0x40] sm:$0xff]  }
0x1356   : > { %3738 = vmatprep.subr.bf16.mxu1 %v4075_v60  ;;  %v4083_v13 = vld [vmem:[%s4528_s18 + $0x60] sm:$0xff]  }
0x1357   : > { %3914 = vmatmul.mubr.msk.f32.vlgmr.msra.gmra.mrb[32].mxu0 %vm1183_vm2, %v2726_v43  ;;  %v4084_v43 = vld [vmem:[%s4528_s18 + $0x20] sm:$0xff]  }
0x1358   : > { %3041 = vmatprep.mubr.bf16.mxu0 %v4291_v28  ;;  %v2868_v28 = vsub.f32 %v2857_v27, %v2866_v42  ;;  %3010 = vmatpush1.bf16.msra.mxu0 %v4051_v55  ;;  %v3629_v27 = vld [vmem:[%s5082_s20] ss:$0 sm:$0xff]  ;;  %v4090_v42 = vld [vmem:[%s4528_s18 + $0x38] sm:$0xff]  }
0x1359   : > { %3011 = vmatprep.subr.bf16.mxu0 %v4056_v57 }
0x135a   : > { %v2870_v54 = vmul.f32 %v2868_v28, %v2868_v28 }
0x135c   : > { %3012 = vmatpush1.bf16.msra.mxu0 %v4054_v58 }
0x135d   : > { %3013 = vmatprep.subr.bf16.mxu0 %v4059_v17 }
0x1360   : > { %3014 = vmatpush1.bf16.msra.mxu0 %v4057_v62 }
0x1361   : > { %3015 = vmatprep.subr.bf16.mxu0 %v4062_v3 }
0x1364   : > { %3016 = vmatpush1.bf16.msra.mxu0 %v4060_v4 }
0x1365   : > { %3017 = vmatprep.subr.bf16.mxu0 %v4065_v21 }
0x1368   : > { %3018 = vmatpush1.bf16.msra.mxu0 %v4063_v5 }
0x1369   : > { %3019 = vmatprep.subr.bf16.mxu0 %v4068_v6 }
0x136c   : > { %3020 = vmatpush1.bf16.msra.mxu0 %v4066_v7 }
0x136d   : > { %3021 = vmatprep.subr.bf16.mxu0 %v4071_v9 }
0x1370   : > { %3022 = vmatpush1.bf16.msra.mxu0 %v4069_v26 }
0x1371   : > { %3023 = vmatprep.subr.bf16.mxu0 %v4074_v10 }
0x1374   : > { %3024 = vmatpush1.bf16.msra.mxu0 %v4072_v11 }
0x142a   : > { %v2799_v35 = vpop.f32.mrb[32].mxu0 }
0x142b   : > { %v2803_v36 = vpack.c.bf16 %v2799_v35, %v2799_v35  ;;  %v3915_v37 = vpop.f32.mrb[33].mxu0  ;;  %v4085_v35 = vld [vmem:[%s4528_s18 + $0x68] sm:$0xff]  }
0x142c   : > { %v4087_v37 = vld [vmem:[%s4528_s18 + $0x70] sm:$0xff]  }
0x142d   : > { %3921 = vmatmul.mubr.msk.bf16.vlgmr.msra.gmra.mrb[36].mxu1 %vm1106_vm1, %v2803_v36  ;;  %v4086_v36 = vld [vmem:[%s4528_s18 + $0x28] sm:$0xff]  }
0x142e   : > { %3739 = vmatpush3.bf16.msra.mxu1 %v4076_v31 }
0x142f   : > { %3740 = vmatprep.subr.bf16.mxu1 %v4077_v59 }
0x1500   : > { %v2841_v41 = vpop.f32.mrb[36].mxu1 }
0x1501   : > { %v2847_v8 = vadd.f32 %v2841_v41, %v2637_v32  ;;  %v3922_v63 = vpop.f32.mrb[37].mxu1  ;;  %v4078_v32 = vld [vmem:[%s4528_s18 + $0x8] sm:$0xff]   ;;  %v4089_v41 = vld [vmem:[%s4528_s18 + $0x78] sm:$0xff]  }
0x1502   : > { %v2844_v45 = vpop.f32.mrb[38].mxu1  ;;  %3741 = vmatpush3.bf16.msra.mxu1 %v4078_v32 }
0x1503   : > { %v2856_v51 = vadd.f32 %v3627_v47, %v2847_v8  ;;  %v3923_v53 = vpop.f32.mrb[39].mxu1  ;;  %3742 = vmatprep.subr.bf16.mxu1 %v4079_v38  ;;  %v2917_v8 = vld [vmem:[%s4572_s19] sm:$0x3] }
0x1504   : > { %v2922_v63 = vrot.slane %v2917_v8, %v874_v52  ;;  %v2926_v45 = vrot.slane %v2917_v8, %v878_v49  ;;  %v3646_v38 = vld [vmem:[%s777_s29] ss:$0 sm:$0xff] }
0x1505   : > { %v2858_v50 = vadd.f32 %v2856_v51, %v4618_v44 }
0x1506   : > { %3743 = vmatpush3.bf16.msra.mxu1 %v4080_v39 }
0x1507   : > { %2863 = vadd.xlane.f32.xlu0 %v2858_v50  ;;  %3744 = vmatprep.subr.bf16.mxu1 %v4081_v33 }
0x150a   : > { %3745 = vmatpush3.bf16.msra.mxu1 %v4082_v34 }
0x150b   : > { %2872 = vadd.xlane.f32.xlu0 %v2870_v54  ;;  %3746 = vmatprep.subr.bf16.mxu1 %v4083_v13 }
0x150e   : > { %3747 = vmatpush3.bf16.msra.mxu1 %v4084_v43 }
0x150f   : > { %3748 = vmatprep.subr.bf16.mxu1 %v4085_v35 }
0x1512   : > { %3749 = vmatpush3.bf16.msra.mxu1 %v4086_v36 }
0x1513   : > { %3750 = vmatprep.subr.bf16.mxu1 %v4087_v37 }
0x1516   : > { %3751 = vmatpush3.bf16.msra.mxu1 %v4088_v40 }
0x1517   : > { %3752 = vmatprep.subr.bf16.mxu1 %v4089_v41 }
0x151a   : > { %3753 = vmatpush3.bf16.msra.mxu1 %v4090_v42 }
0x1594   : > { %v2864_v44 = vpop.xlane.xlu0 %2863 }
0x1595   : > { %v2867_v1 = vmul.f32 0.0078125, %v2864_v44 }
0x1597   : > { %v2869_v16 = vsub.f32 %v2858_v50, %v2867_v1 }
0x1598   : > { %v2873_v12 = vpop.xlane.xlu0 %2872 }
0x1599   : > { %v2871_v2 = vmul.f32 %v2869_v16, %v2869_v16  ;;  %v2876_v14 = vmul.f32 0.0078125, %v2873_v12 }
0x159b   : > { %2874 = vadd.xlane.f32.xlu0 %v2871_v2  ;;  %v2878_v15 = vadd.f32 1e-12, %v2876_v14 }
0x159d   : > { %4123 = vrsqrt.f32 %v2878_v15 }
0x15a7   : > { %v4124_v20 = vpop.eup %4123 }
0x15a8   : > { %v2882_v22 = vmul.f32 %v4124_v20, %v2868_v28 }
0x15aa   : > { %v2890_v25 = vmul.f32 %v3628_v23, %v2882_v22 }
0x15ac   : > { %v4934_v46 = vadd.f32 %v3629_v27, %v2890_v25 }
0x1628   : > { %v2875_v61 = vpop.xlane.xlu0 %2874 }
0x1629   : > { %v2877_v18 = vmul.f32 0.0078125, %v2875_v61 }
0x162b   : > { %v2879_v19 = vadd.f32 1e-12, %v2877_v18 }
0x162d   : > { %4125 = vrsqrt.f32 %v2879_v19 }
0x1637   : > { %v4126_v24 = vpop.eup %4125 }
0x1638   : > { %v2883_v47 = vmul.f32 %v4126_v24, %v2869_v16 }
0x163a   : > { %v2891_v0 = vmul.f32 %v3628_v23, %v2883_v47 }
0x163c   : > { %v4936_v29 = vadd.f32 %v3629_v27, %v2891_v0 }
0x163e   : > { %v2900_v30 = vpack.c.bf16 %v4936_v29, %v4934_v46 }
0x1640   : > { %3042 = vmatmul.mubr.bf16.vlgmr.msra.gmra.mrb[36].mxu0 %v2900_v30 }
0x1713   : > { %v3043_v51 = vpop.f32.mrb[36].mxu0 }
0x1714   : > { %v3044_v53 = vadd.f32 %v3043_v51, %v2922_v63  ;;  %v3045_v28 = vpop.f32.mrb[37].mxu0 }
0x1715   : > { %v3046_v50 = vadd.f32 %v3045_v28, %v2926_v45  ;;  %v3047_v54 = vpop.f32.mrb[38].mxu0 }
0x1716   : > { %v3056_v55 = vmul.f32 0.044715, %v3044_v53  ;;  %v3048_v56 = vadd.f32 %v3047_v54, %v2922_v63  ;;  %v3049_v57 = vpop.f32.mrb[39].mxu0  ;;  %v3052_v20 = vmul.f32 0.5, %v3044_v53 }
0x1717   : > { %v3057_v58 = vmul.f32 0.044715, %v3046_v50  ;;  %v3050_v17 = vadd.f32 %v3049_v57, %v2926_v45  ;;  %v3053_v24 = vmul.f32 0.5, %v3046_v50 }
0x1718   : > { %v3060_v62 = vmul.f32 %v3056_v55, %v3044_v53  ;;  %v3058_v44 = vmul.f32 0.044715, %v3048_v56  ;;  %v3054_v22 = vmul.f32 0.5, %v3048_v56 }
0x1719   : > { %v3061_v1 = vmul.f32 %v3057_v58, %v3046_v50  ;;  %v3059_v16 = vmul.f32 0.044715, %v3050_v17  ;;  %v3055_v47 = vmul.f32 0.5, %v3050_v17  ;;  %v3663_v58 = vld [vmem:[%s780_s22] ss:$0 sm:$0xff] }
0x171a   : > { %v3064_v2 = vmul.f32 %v3060_v62, %v3044_v53  ;;  %v3062_v3 = vmul.f32 %v3058_v44, %v3048_v56  ;;  %v3664_v62 = vld [vmem:[%s783_s1] ss:$0 sm:$0xff] }
0x171b   : > { %v3065_v52 = vmul.f32 %v3061_v1, %v3046_v50  ;;  %v3063_v4 = vmul.f32 %v3059_v16, %v3050_v17 }
0x171c   : > { %v3068_v48 = vadd.f32 %v3064_v2, %v3044_v53  ;;  %v3066_v49 = vmul.f32 %v3062_v3, %v3048_v56 }
0x171d   : > { %v3067_v21 = vmul.f32 %v3063_v4, %v3050_v17  ;;  %v3069_v5 = vadd.f32 %v3065_v52, %v3046_v50 }
0x171e   : > { %v3072_v6 = vmul.f32 0.7978846, %v3068_v48  ;;  %v3070_v7 = vadd.f32 %v3066_v49, %v3048_v56 }
0x171f   : > { %v3071_v9 = vadd.f32 %v3067_v21, %v3050_v17  ;;  %v3073_v26 = vmul.f32 0.7978846, %v3069_v5 }
0x1720   : > { %4127 = vtanh.f32 %v3072_v6  ;;  %v3074_v10 = vmul.f32 0.7978846, %v3070_v7 }
0x1721   : > { %v3075_v11 = vmul.f32 0.7978846, %v3071_v9  ;;  %4129 = vtanh.f32 %v3073_v26 }
0x1722   : > { %4131 = vtanh.f32 %v3074_v10 }
0x1723   : > { %4133 = vtanh.f32 %v3075_v11 }
0x172a   : > { %v4128_v12 = vpop.eup %4127 }
0x172b   : > { %v4130_v14 = vpop.eup %4129  ;;  %v3080_v15 = vadd.f32 1.0, %v4128_v12 }
0x172c   : > { %v4132_v61 = vpop.eup %4131  ;;  %v3081_v18 = vadd.f32 1.0, %v4130_v14 }
0x172d   : > { %v4134_v19 = vpop.eup %4133  ;;  %v3082_v23 = vadd.f32 1.0, %v4132_v61  ;;  %v3084_v27 = vmul.f32 %v3080_v15, %v3052_v20 }
0x172e   : > { %v3083_v25 = vadd.f32 1.0, %v4134_v19  ;;  %v3085_v30 = vmul.f32 %v3081_v18, %v3053_v24 }
0x172f   : > { %v3086_v0 = vmul.f32 %v3082_v23, %v3054_v22 }
0x1730   : > { %v3087_v60 = vmul.f32 %v3083_v25, %v3055_v47 }
0x1731   : > { %v3088_v31 = vpack.c.bf16 %v3086_v0, %v3084_v27 }
0x1732   : > { %v3089_v59 = vpack.c.bf16 %v3087_v60, %v3085_v30 }
0x1734   : > { %3257 = vmatprep.mubr.bf16.mxu1 %v3089_v59 }
0x1735   : > { %3258 = vmatmul.mubr.bf16.vlgmr.msra.gmra.mrb[40].mxu1 %v3088_v31 }
0x1808   : > { %v3754_v32 = vpop.f32.mrb[40].mxu1 }
0x1809   : > { %v3755_v39 = vpop.f32.mrb[41].mxu1 }
0x180a   : > { %v3756_v33 = vadd.f32 %v3755_v39, %v3754_v32  ;;  %v3757_v34 = vpop.f32.mrb[42].mxu1 }
0x180b   : > { %v3758_v13 = vpop.f32.mrb[43].mxu1 }
0x180c   : > { %v3260_v43 = vadd.f32 %v3756_v33, %v3646_v38  ;;  %v3759_v35 = vadd.f32 %v3758_v13, %v3757_v34 }
0x180e   : > { %v3263_v36 = vadd.f32 %v3759_v35, %v3646_v38  ;;  %v3266_v37 = vadd.f32 %v3260_v43, %v4934_v46 }
0x1810   : > { %3270 = vadd.xlane.f32.xlu0 %v3266_v37  ;;  %v3267_v40 = vadd.f32 %v3263_v36, %v4936_v29 }
0x1814   : > { %3272 = vadd.xlane.f32.xlu0 %v3267_v40 }
0x189d   : > { %v3271_v41 = vpop.xlane.xlu0 %3270 }
0x189e   : > { %v3274_v42 = vmul.f32 0.0078125, %v3271_v41 }
0x18a0   : > { %v3276_v8 = vsub.f32 %v3266_v37, %v3274_v42 }
0x18a1   : > { %v3273_v63 = vpop.xlane.xlu0 %3272 }
0x18a2   : > { %v3275_v45 = vmul.f32 0.0078125, %v3273_v63  ;;  %v3278_v51 = vmul.f32 %v3276_v8, %v3276_v8 }
0x18a4   : > { %v3277_v53 = vsub.f32 %v3267_v40, %v3275_v45  ;;  %3280 = vadd.xlane.f32.xlu0 %v3278_v51 }
0x18a6   : > { %v3279_v28 = vmul.f32 %v3277_v53, %v3277_v53 }
0x18a8   : > { %3282 = vadd.xlane.f32.xlu1 %v3279_v28 }
0x1931   : > { %v3281_v50 = vpop.xlane.xlu0 %3280 }
0x1932   : > { %v3284_v54 = vmul.f32 0.0078125, %v3281_v50 }
0x1934   : > { %v3286_v55 = vadd.f32 1e-12, %v3284_v54 }
0x1935   : > { %v3283_v46 = vpop.xlane.xlu1 %3282 }
0x1936   : > { %4135 = vrsqrt.f32 %v3286_v55  ;;  %v3285_v56 = vmul.f32 0.0078125, %v3283_v46 }
0x1938   : > { %v3287_v29 = vadd.f32 1e-12, %v3285_v56 }
0x193a   : > { %4137 = vrsqrt.f32 %v3287_v29 }
0x1940   : > { %v4136_v57 = vpop.eup %4135 }
0x1941   : > { %v3290_v17 = vmul.f32 %v4136_v57, %v3276_v8 }
0x1943   : > { %v3298_v44 = vmul.f32 %v3663_v58, %v3290_v17 }
0x1944   : > { %v4138_v1 = vpop.eup %4137 }
0x1945   : > { %v3306_v16 = vadd.f32 %v3664_v62, %v3298_v44  ;;  %v3291_v2 = vmul.f32 %v4138_v1, %v3277_v53  ;;  %3313 = sbr.rel (%p3665_p4) target bundleno = 6476 (0x194c), region = 100 }
0x1947   : > { %3308 = vst [vmem:[#allocation2] sm:$0xff] %v3306_v16  ;;  %v3299_v3 = vmul.f32 %v3663_v58, %v3291_v2  ;;  %3314 = vst [vmem:[#allocation8] sm:$0xff] (!%p3665_p4), %v3306_v16 }
0x1949   : > { %v3307_v52 = vadd.f32 %v3664_v62, %v3299_v3 }
0x194b   : > { %3309 = vst [vmem:[#allocation2 + $0x8] sm:$0xff] %v3307_v52  ;;  %3315 = vst [vmem:[#allocation8 + $0x8] sm:$0xff] (!%p3665_p4), %v3307_v52 }
0x194c PF: > { %s5083_s22 = sld [smem:[#allocation15_spill]]  ;;  %s4297_s2 = smov [#allocation8]  }
0x194d   : > { %s3325_s1 = sshll.u32 %s4297_s2, 4  ;;  %s3326_s1 = int_to_ptr.vmem [resolvable:$true] %s3325_s1 }
0x194e   : > { %s4199_s3 = scalar_lea.vmem %s3326_s1, 256  ;;  %p4206_p3 = scmp.lt.s32.totalorder %s3326_s1, %s3326_s1 }
0x194f   : > { %p4200_p1 = scmp.ne.s32.totalorder %s3326_s1, %s4199_s3  ;;  %p4207_p5 = scmp.lt.s32.totalorder %s4199_s3, %s4199_s3 }
0x1951   : > { %p4208_p6 = por %p4207_p5, %p4206_p3 }
0x1952   : > { %s5084_s21 = sadd.s32 4294967295, %s5083_s22  }
0x1953   : > { %p4981_p8 = scmp.eq.s32.totalorder %s5084_s21, 1 }
0x1955   : > { %p4201_p2 = pnand %p4200_p1, %p4981_p8 }
0x1957   : > { %p4202_p13 = pneg %p4201_p2 }
0x1959   : > { %p4209_p10 = pnand %p4208_p6, %p4202_p13 }
0x195b   : > { %4212 = shalt.err (!%p4209_p10)
}
0x195c   : > { %s5086_s26 = sld [smem:[#allocation26_spill]] }
0x1962   : > { %s5087_s17 = smov %s5086_s26  ;;  %s4213_s4 = scalar_lea.hbm %s5086_s26, 256 }
0x1963   : > { %p4214_p12 = scmp.ne.s32.totalorder %s5087_s17, %s4213_s4  ;;  %p4219_p9 = scmp.lt.u32.totalorder %s4213_s4, %s5087_s17 }
0x1965   : > { %p4215_p0 = pnand %p4214_p12, %p4981_p8 }
0x1967   : > { %p4216_p7 = pneg %p4215_p0 }
0x1969   : > { %p4221_p11 = pnand %p4219_p9, %p4216_p7 }
0x196b   : > { %4224 = shalt.err (!%p4221_p11)
}
0x196c   : > { %s4298_s18 = smov 128   ;;  %s4299_s19 = smov 8  }
0x196d   : > { %3933 = dma.vmem_to_hbm [thread:$0]  (%p4981_p8), %s3326_s1, 256, %s5087_s17, [#allocation5], %s4298_s18, %s4298_s18, %s4299_s19  }
0x196e   : > { %4258 = dma.done.wait (%p4981_p8), [#allocation5], 256  }
0x196f   : > { %4260 = vsyncadd (%p4981_p8), [#allocation5], 4294967040 }
0x1970 PF: > { %s5088_s0 = sld [smem:[#allocation15_spill]]  ;;  %s5089_s21 = sld [smem:[#allocation12_spill]] }
0x1971   : > { %s5090_s22 = sld [smem:[#allocation13_spill]]  ;;  %s5091_s23 = sld [smem:[#allocation17_spill]] }
0x1972   : > { %s5092_s24 = sld [smem:[#allocation14_spill]]  ;;  %s5093_s25 = sld [smem:[#allocation16_spill]] }
0x1976   : > { %s33_s26 = sadd.s32 1, %s5088_s0  }
0x1977   : > { %p30_p4 = scmp.ge.s32.totalorder %s33_s26, 4  }
0x1979   :  { %32 = sbr.rel (!%p30_p4) target bundleno = 17 (0x11), region = 180 }
0x1980   :  { %3341 = vsyncpa [#allocation4], 1 }
0x1981   :  { %3343 = vsyncpa [#allocation4 + $0x1], 1 }
0x1982   :  { %3344 = vsyncpa [#allocation7], 1 }
0x1983   :  { %3346 = vsyncpa [#allocation7 + $0x1], 1 }
0x1984   :  { %3347 = vsyncpa [#allocation5], 1 }
0x1985   :  { %3349 = vsyncpa [#allocation5 + $0x1], 1 }

</bundles_post_ra>
